<compile_context>
chip_gen: v7x
topology: tpu7x:2x2x1
jax: 0.10.0
libtpu: 0.0.40
codegen_flags: <defaults>
</compile_context>

<pallas_src>
import functools
import math

import numpy as np

import jax
import jax.numpy as jnp
from jax import lax
from jax.experimental import pallas as pl
from jax.experimental.pallas import tpu as pltpu

# MXU operand dtype: bf16 is native on v6e/v7x (f32 accumulation is kept).
# Set to jnp.float32 if exact-f32 matmuls are required.
MXU_DTYPE = jnp.bfloat16


# ------------------------------ Pallas kernel -------------------------------


def _fused_offsetnet_kernel(*refs, layer_dims):
    """Whole-network forward in one kernel invocation.

    refs = [x2d] + per-layer [L, B (, bn_scale, bn_bias)]
           + [fc_w, fc_b, clip_lo, clip_hi, out]
    layer_dims: tuple of (r_out, k_in, k_out, bn_act) static ints/flags.
    """
    it = iter(refs)
    x = next(it)[...].astype(jnp.float32)                      # (N*H0, W0*C0)

    for (r_out, k_in, k_out, bn_act) in layer_dims:
        l_ref = next(it)                                       # (3, r_out, r_in) bf16
        b_ref = next(it)                                       # (3, k_in, k_out) bf16
        xc = x.astype(MXU_DTYPE)
        acc = jnp.zeros((r_out, k_out), jnp.float32)
        for ky in range(3):
            # vertical tap shift + stride + zero-pad via row-selector matmul
            shifted = jnp.dot(l_ref[ky], xc, preferred_element_type=jnp.float32)
            # horizontal taps + stride + zero-pad folded into the weight matrix
            acc = acc + jnp.dot(shifted.astype(MXU_DTYPE), b_ref[ky],
                                preferred_element_type=jnp.float32)
        if bn_act:
            scale = next(it)[...]                              # (1, k_out) f32
            bias = next(it)[...]                               # (1, k_out) f32
            acc = jnp.maximum(acc * scale + bias, 0.0)         # BN(eval) + ReLU
        x = acc

    # Head: Linear (z-renorm folded into weights) + per-channel clip.
    fcw = next(it)[...]                                        # (feat, O) bf16
    fcb = next(it)[...]                                        # (1, O) f32
    clip_lo = next(it)[...]                                    # (1, O) f32
    clip_hi = next(it)[...]                                    # (1, O) f32
    o_ref = next(it)
    y = jnp.dot(x.astype(MXU_DTYPE), fcw, preferred_element_type=jnp.float32) + fcb
    y = jnp.minimum(jnp.maximum(y, clip_lo), clip_hi)
    o_ref[...] = y.astype(o_ref.dtype)


# -------------------------- operand construction ----------------------------


def _build_row_selectors(n, h_in, h_out, stride):
    """(3, N*h_out, N*h_in) 0/1 matrices: vertical tap shift + stride + zero pad."""
    sel = np.zeros((3, n * h_out, n * h_in), np.float32)
    for ky in range(3):
        for b in range(n):
            for ho in range(h_out):
                hs = stride * ho + ky - 1
                if 0 <= hs < h_in:
                    sel[ky, b * h_out + ho, b * h_in + hs] = 1.0
    return jnp.asarray(sel, dtype=MXU_DTYPE)


def _build_width_folded_weights(w_oihw, w_in, w_out, stride):
    """Fold the 3 horizontal taps (+stride+pad) into (3, W_in*Cin, W_out*Cout)."""
    cout, cin, kh, kw = w_oihw.shape
    wt = jnp.transpose(w_oihw, (2, 3, 1, 0))                   # (kh, kw, cin, cout)
    wi = np.arange(w_in)[:, None]
    wo = np.arange(w_out)[None, :]
    dx = wi - stride * wo + 1                                  # (w_in, w_out)
    valid = jnp.asarray(((dx >= 0) & (dx < kw)).astype(np.float32))
    dxc = jnp.asarray(np.clip(dx, 0, kw - 1).astype(np.int32))
    blocks = []
    for ky in range(kh):
        g = jnp.take(wt[ky], dxc, axis=0)                      # (w_in, w_out, cin, cout)
        g = g * valid[:, :, None, None]
        g = jnp.transpose(g, (0, 2, 1, 3)).reshape(w_in * cin, w_out * cout)
        blocks.append(g)
    return jnp.stack(blocks, axis=0).astype(MXU_DTYPE)         # (3, w_in*cin, w_out*cout)


def fold_batchnorm(gamma, beta, mean, var, eps=1e-5):
    scale = gamma / jnp.sqrt(var + eps)
    return scale, beta - mean * scale


def prepare_operands(params, n, h, w):
    """One-time host-side folding of all constants (done OUTSIDE the hot path)."""
    # Layer list: first conv (s=1, no BN/act) + downsample blocks (s=2, BN+ReLU).
    convs = [(params["conv0_w"], 1, None, None)]
    for layer in params["down"]:
        sc, bi = fold_batchnorm(layer["gamma"], layer["beta"],
                                layer["mean"], layer["var"])
        convs.append((layer["w"], 2, sc, bi))

    ops = []
    layer_dims = []
    h_in, w_in = h, w
    for (wgt, stride, scale, bias) in convs:
        cout, cin_l, _, _ = wgt.shape
        h_out = (h_in + 2 - 3) // stride + 1
        w_out = (w_in + 2 - 3) // stride + 1
        ops.append(_build_row_selectors(n, h_in, h_out, stride))
        ops.append(_build_width_folded_weights(wgt, w_in, w_out, stride))
        bn_act = scale is not None
        if bn_act:
            ops.append(jnp.tile(scale, w_out)[None, :].astype(jnp.float32))
            ops.append(jnp.tile(bias, w_out)[None, :].astype(jnp.float32))
        layer_dims.append((n * h_out, w_in * cin_l, w_out * cout, bn_act))
        h_in, w_in = h_out, w_out

    # Head: fold znorm (y*z1 + z0) into the FC weight/bias; clip stays per-channel.
    # NOTE: flatten is NHWC here vs NCHW in PyTorch; identical because the
    # target spatial size is 1x1.
    z0, z1 = params["z_values"][0], params["z_values"][1]
    fc_w = (params["fc_w"] * z1[None, :]).astype(MXU_DTYPE)
    fc_b = (params["fc_b"] * z1[None, :] + z0[None, :]).astype(jnp.float32)
    clip_lo = params["clip_minmax"][0][None, :].astype(jnp.float32)
    clip_hi = params["clip_minmax"][1][None, :].astype(jnp.float32)
    ops += [fc_w, fc_b, clip_lo, clip_hi]

    out_channels = fc_w.shape[1]
    return ops, tuple(layer_dims), out_channels


# ------------------------------ public forward ------------------------------


def offset_net_v2_forward(ops, x_nchw, *, layer_dims, out_channels):
    """x_nchw: (N, Cin, H, W) float32 -> (N, out_channels) float32."""
    # Pre-norm: identity (see TODO at top of file).
    n, cin0, h, w = x_nchw.shape
    x2d = jnp.transpose(x_nchw, (0, 2, 3, 1)).reshape(n * h, w * cin0).astype(jnp.float32)

    inputs = [x2d] + list(ops)
    kernel = functools.partial(_fused_offsetnet_kernel, layer_dims=layer_dims)
    in_specs = [pl.BlockSpec(a.shape, lambda i, nd=a.ndim: (0,) * nd) for a in inputs]
    return pl.pallas_call(
        kernel,
        out_shape=jax.ShapeDtypeStruct((n, out_channels), jnp.float32),
        grid=(1,),
        in_specs=in_specs,
        out_specs=pl.BlockSpec((n, out_channels), lambda i: (0, 0)),
        compiler_params=pltpu.CompilerParams(dimension_semantics=("arbitrary",)),
    )(*inputs)


# ------------------------------ reference path ------------------------------


def reference_forward(params, x_nchw):
    """Pure-JAX/XLA reference matching the PyTorch module (eval mode)."""
    dn = ("NCHW", "OIHW", "NCHW")
    y = lax.conv_general_dilated(x_nchw.astype(jnp.float32), params["conv0_w"],
                                 (1, 1), ((1, 1), (1, 1)), dimension_numbers=dn)
    for layer in params["down"]:
        y = lax.conv_general_dilated(y, layer["w"], (2, 2), ((1, 1), (1, 1)),
                                     dimension_numbers=dn)
        sc, bi = fold_batchnorm(layer["gamma"], layer["beta"],
                                layer["mean"], layer["var"])
        y = jnp.maximum(y * sc[None, :, None, None] + bi[None, :, None, None], 0.0)
    feat = y.reshape(y.shape[0], -1)          # PyTorch NCHW flatten (1x1 spatial here)
    o = feat @ params["fc_w"] + params["fc_b"]
    o = o * params["z_values"][1][None, :] + params["z_values"][0][None, :]
    return jnp.clip(o, params["clip_minmax"][0][None, :],
                    params["clip_minmax"][1][None, :])


# --------------------------------- params -----------------------------------


def init_params(key, in_channels, base_channels, out_channels,
                from_size, target_size=1, max_channels=128):
    layers = int(math.log2(from_size)) - int(math.log2(target_size))
    channels = [min(base_channels * 2 ** i, max_channels) for i in range(layers)]

    keys = jax.random.split(key, layers + 2)
    params = {}
    params["conv0_w"] = 0.1 * jax.random.normal(
        keys[0], (base_channels, in_channels, 3, 3), jnp.float32)

    in_c = base_channels
    down = []
    for i in range(layers):
        out_c = channels[i]
        down.append({
            "w": 0.1 * jax.random.normal(keys[1 + i], (out_c, in_c, 3, 3), jnp.float32),
            "gamma": 1.0 + 0.01 * jnp.arange(out_c, dtype=jnp.float32),
            "beta": 0.01 * jnp.arange(out_c, dtype=jnp.float32),
            "mean": 0.001 * jnp.arange(out_c, dtype=jnp.float32),
            "var": jnp.ones((out_c,), jnp.float32),
        })
        in_c = out_c
    params["down"] = down

    feat = in_c * target_size ** 2
    params["fc_w"] = 0.1 * jax.random.normal(keys[-1], (feat, out_channels), jnp.float32)
    params["fc_b"] = 0.01 * jnp.arange(out_channels, dtype=jnp.float32)[None, :]

    o = jnp.arange(out_channels, dtype=jnp.float32)
    params["z_values"] = jnp.stack([0.01 * o, 1.0 + 0.05 * o], axis=0)          # (2, O)
    params["clip_minmax"] = jnp.stack([-1.0 - 0.1 * o, 1.0 + 0.1 * o], axis=0)  # (2, O)
    return params, channels


# ---------------------------------- main -------------------------------------

if __name__ == "__main__":
    # Shapes consistent with the module: 2-channel 16x16 input maps,
    # base_channels=8, max_channels=32, from_size=16, target_size=1, out=8.
    N, IN_C, FROM_SIZE = 2, 2, 16
    BASE_C, MAX_C, OUT_C = 8, 32, 8

    key = jax.random.PRNGKey(0)
    k_param, k_x = jax.random.split(key)
    params, channels = init_params(k_param, IN_C, BASE_C, OUT_C,
                                   FROM_SIZE, target_size=1, max_channels=MAX_C)
    x = jax.random.normal(k_x, (N, IN_C, FROM_SIZE, FROM_SIZE), jnp.float32)

    # One-time constant folding (outside the hot path), then the jitted forward.
    ops, layer_dims, out_channels = prepare_operands(params, N, FROM_SIZE, FROM_SIZE)
    fwd = jax.jit(functools.partial(offset_net_v2_forward,
                                    layer_dims=layer_dims,
                                    out_channels=out_channels))
    out = jax.block_until_ready(fwd(ops, x))
    assert out.shape == (N, OUT_C), out.shape

    # Sanity check against a pure-JAX reference (loose tol: bf16 MXU operands).
    ref = jax.block_until_ready(reference_forward(params, x))
    err = float(jnp.max(jnp.abs(out - ref)))
    assert err < 1e-1, f"max abs error vs reference = {err}"

    print("KERNEL_OK")
</pallas_src>

<mosaic_0001>
module attributes {stable_mosaic.version = 11 : i64} {
  func.func @_fused_offsetnet_kernel(%arg0: i32, %arg1: memref<32x32xf32, #tpu.memory_space<vmem>>, %arg2: memref<3x32x32xbf16, #tpu.memory_space<vmem>>, %arg3: memref<3x32x128xbf16, #tpu.memory_space<vmem>>, %arg4: memref<3x16x32xbf16, #tpu.memory_space<vmem>>, %arg5: memref<3x128x64xbf16, #tpu.memory_space<vmem>>, %arg6: memref<1x64xf32, #tpu.memory_space<vmem>>, %arg7: memref<1x64xf32, #tpu.memory_space<vmem>>, %arg8: memref<3x8x16xbf16, #tpu.memory_space<vmem>>, %arg9: memref<3x64x64xbf16, #tpu.memory_space<vmem>>, %arg10: memref<1x64xf32, #tpu.memory_space<vmem>>, %arg11: memref<1x64xf32, #tpu.memory_space<vmem>>, %arg12: memref<3x4x8xbf16, #tpu.memory_space<vmem>>, %arg13: memref<3x64x64xbf16, #tpu.memory_space<vmem>>, %arg14: memref<1x64xf32, #tpu.memory_space<vmem>>, %arg15: memref<1x64xf32, #tpu.memory_space<vmem>>, %arg16: memref<3x2x4xbf16, #tpu.memory_space<vmem>>, %arg17: memref<3x64x32xbf16, #tpu.memory_space<vmem>>, %arg18: memref<1x32xf32, #tpu.memory_space<vmem>>, %arg19: memref<1x32xf32, #tpu.memory_space<vmem>>, %arg20: memref<32x8xbf16, #tpu.memory_space<vmem>>, %arg21: memref<1x8xf32, #tpu.memory_space<vmem>>, %arg22: memref<1x8xf32, #tpu.memory_space<vmem>>, %arg23: memref<1x8xf32, #tpu.memory_space<vmem>>, %arg24: memref<2x8xf32, #tpu.memory_space<vmem>>) attributes {dimension_semantics = [#tpu.dimension_semantics<arbitrary>], iteration_bounds = array<i64: 1>, scalar_prefetch = 0 : i64, scratch_operands = 0 : i64, tpu.core_type = #tpu.core_type<tc>, window_params = [{pipeline_mode = #tpu.pipeline_mode<synchronous>, transform_indices = @transform_0, window_bounds = array<i64: 32, 32>}, {pipeline_mode = #tpu.pipeline_mode<synchronous>, transform_indices = @transform_1, window_bounds = array<i64: 3, 32, 32>}, {pipeline_mode = #tpu.pipeline_mode<synchronous>, transform_indices = @transform_2, window_bounds = array<i64: 3, 32, 128>}, {pipeline_mode = #tpu.pipeline_mode<synchronous>, transform_indices = @transform_3, window_bounds = array<i64: 3, 16, 32>}, {pipeline_mode = #tpu.pipeline_mode<synchronous>, transform_indices = @transform_4, window_bounds = array<i64: 3, 128, 64>}, {pipeline_mode = #tpu.pipeline_mode<synchronous>, transform_indices = @transform_5, window_bounds = array<i64: 1, 64>}, {pipeline_mode = #tpu.pipeline_mode<synchronous>, transform_indices = @transform_6, window_bounds = array<i64: 1, 64>}, {pipeline_mode = #tpu.pipeline_mode<synchronous>, transform_indices = @transform_7, window_bounds = array<i64: 3, 8, 16>}, {pipeline_mode = #tpu.pipeline_mode<synchronous>, transform_indices = @transform_8, window_bounds = array<i64: 3, 64, 64>}, {pipeline_mode = #tpu.pipeline_mode<synchronous>, transform_indices = @transform_9, window_bounds = array<i64: 1, 64>}, {pipeline_mode = #tpu.pipeline_mode<synchronous>, transform_indices = @transform_10, window_bounds = array<i64: 1, 64>}, {pipeline_mode = #tpu.pipeline_mode<synchronous>, transform_indices = @transform_11, window_bounds = array<i64: 3, 4, 8>}, {pipeline_mode = #tpu.pipeline_mode<synchronous>, transform_indices = @transform_12, window_bounds = array<i64: 3, 64, 64>}, {pipeline_mode = #tpu.pipeline_mode<synchronous>, transform_indices = @transform_13, window_bounds = array<i64: 1, 64>}, {pipeline_mode = #tpu.pipeline_mode<synchronous>, transform_indices = @transform_14, window_bounds = array<i64: 1, 64>}, {pipeline_mode = #tpu.pipeline_mode<synchronous>, transform_indices = @transform_15, window_bounds = array<i64: 3, 2, 4>}, {pipeline_mode = #tpu.pipeline_mode<synchronous>, transform_indices = @transform_16, window_bounds = array<i64: 3, 64, 32>}, {pipeline_mode = #tpu.pipeline_mode<synchronous>, transform_indices = @transform_17, window_bounds = array<i64: 1, 32>}, {pipeline_mode = #tpu.pipeline_mode<synchronous>, transform_indices = @transform_18, window_bounds = array<i64: 1, 32>}, {pipeline_mode = #tpu.pipeline_mode<synchronous>, transform_indices = @transform_19, window_bounds = array<i64: 32, 8>}, {pipeline_mode = #tpu.pipeline_mode<synchronous>, transform_indices = @transform_20, window_bounds = array<i64: 1, 8>}, {pipeline_mode = #tpu.pipeline_mode<synchronous>, transform_indices = @transform_21, window_bounds = array<i64: 1, 8>}, {pipeline_mode = #tpu.pipeline_mode<synchronous>, transform_indices = @transform_22, window_bounds = array<i64: 1, 8>}, {pipeline_mode = #tpu.pipeline_mode<synchronous>, transform_indices = @transform_23, window_bounds = array<i64: 2, 8>}]} {
    %c0 = arith.constant 0 : index
    %c0_0 = arith.constant 0 : index
    %0 = vector.load %arg1[%c0, %c0_0] : memref<32x32xf32, #tpu.memory_space<vmem>>, vector<32x32xf32>
    %1 = arith.truncf %0 : vector<32x32xf32> to vector<32x32xbf16>
    %cst = arith.constant 0.000000e+00 : f32
    %2 = vector.broadcast %cst : f32 to vector<32x128xf32>
    %c0_1 = arith.constant 0 : index
    %c0_2 = arith.constant 0 : index
    %c0_3 = arith.constant 0 : index
    %3 = vector.load %arg2[%c0_1, %c0_2, %c0_3] : memref<3x32x32xbf16, #tpu.memory_space<vmem>>, vector<1x32x32xbf16>
    %4 = vector.shape_cast %3 : vector<1x32x32xbf16> to vector<32x32xbf16>
    %cst_4 = arith.constant dense<0.000000e+00> : vector<32x32xf32>
    %5 = tpu.matmul %4, %1, %cst_4 {dimension_numbers = #tpu.dot_dimension_numbers<[1], [0], [0], [1], [0, 0, 1, 1], [], []>} : vector<32x32xbf16>, vector<32x32xbf16>, vector<32x32xf32> -> vector<32x32xf32>
    %6 = arith.truncf %5 : vector<32x32xf32> to vector<32x32xbf16>
    %c0_5 = arith.constant 0 : index
    %c0_6 = arith.constant 0 : index
    %c0_7 = arith.constant 0 : index
    %7 = vector.load %arg3[%c0_5, %c0_6, %c0_7] : memref<3x32x128xbf16, #tpu.memory_space<vmem>>, vector<1x32x128xbf16>
    %8 = vector.shape_cast %7 : vector<1x32x128xbf16> to vector<32x128xbf16>
    %cst_8 = arith.constant dense<0.000000e+00> : vector<32x128xf32>
    %9 = tpu.matmul %6, %8, %cst_8 {dimension_numbers = #tpu.dot_dimension_numbers<[1], [0], [0], [1], [0, 0, 1, 1], [], []>} : vector<32x32xbf16>, vector<32x128xbf16>, vector<32x128xf32> -> vector<32x128xf32>
    %10 = arith.addf %2, %9 : vector<32x128xf32>
    %c1 = arith.constant 1 : index
    %c0_9 = arith.constant 0 : index
    %c0_10 = arith.constant 0 : index
    %11 = vector.load %arg2[%c1, %c0_9, %c0_10] : memref<3x32x32xbf16, #tpu.memory_space<vmem>>, vector<1x32x32xbf16>
    %12 = vector.shape_cast %11 : vector<1x32x32xbf16> to vector<32x32xbf16>
    %cst_11 = arith.constant dense<0.000000e+00> : vector<32x32xf32>
    %13 = tpu.matmul %12, %1, %cst_11 {dimension_numbers = #tpu.dot_dimension_numbers<[1], [0], [0], [1], [0, 0, 1, 1], [], []>} : vector<32x32xbf16>, vector<32x32xbf16>, vector<32x32xf32> -> vector<32x32xf32>
    %14 = arith.truncf %13 : vector<32x32xf32> to vector<32x32xbf16>
    %c1_12 = arith.constant 1 : index
    %c0_13 = arith.constant 0 : index
    %c0_14 = arith.constant 0 : index
    %15 = vector.load %arg3[%c1_12, %c0_13, %c0_14] : memref<3x32x128xbf16, #tpu.memory_space<vmem>>, vector<1x32x128xbf16>
    %16 = vector.shape_cast %15 : vector<1x32x128xbf16> to vector<32x128xbf16>
    %cst_15 = arith.constant dense<0.000000e+00> : vector<32x128xf32>
    %17 = tpu.matmul %14, %16, %cst_15 {dimension_numbers = #tpu.dot_dimension_numbers<[1], [0], [0], [1], [0, 0, 1, 1], [], []>} : vector<32x32xbf16>, vector<32x128xbf16>, vector<32x128xf32> -> vector<32x128xf32>
    %18 = arith.addf %10, %17 : vector<32x128xf32>
    %c2 = arith.constant 2 : index
    %c0_16 = arith.constant 0 : index
    %c0_17 = arith.constant 0 : index
    %19 = vector.load %arg2[%c2, %c0_16, %c0_17] : memref<3x32x32xbf16, #tpu.memory_space<vmem>>, vector<1x32x32xbf16>
    %20 = vector.shape_cast %19 : vector<1x32x32xbf16> to vector<32x32xbf16>
    %cst_18 = arith.constant dense<0.000000e+00> : vector<32x32xf32>
    %21 = tpu.matmul %20, %1, %cst_18 {dimension_numbers = #tpu.dot_dimension_numbers<[1], [0], [0], [1], [0, 0, 1, 1], [], []>} : vector<32x32xbf16>, vector<32x32xbf16>, vector<32x32xf32> -> vector<32x32xf32>
    %22 = arith.truncf %21 : vector<32x32xf32> to vector<32x32xbf16>
    %c2_19 = arith.constant 2 : index
    %c0_20 = arith.constant 0 : index
    %c0_21 = arith.constant 0 : index
    %23 = vector.load %arg3[%c2_19, %c0_20, %c0_21] : memref<3x32x128xbf16, #tpu.memory_space<vmem>>, vector<1x32x128xbf16>
    %24 = vector.shape_cast %23 : vector<1x32x128xbf16> to vector<32x128xbf16>
    %cst_22 = arith.constant dense<0.000000e+00> : vector<32x128xf32>
    %25 = tpu.matmul %22, %24, %cst_22 {dimension_numbers = #tpu.dot_dimension_numbers<[1], [0], [0], [1], [0, 0, 1, 1], [], []>} : vector<32x32xbf16>, vector<32x128xbf16>, vector<32x128xf32> -> vector<32x128xf32>
    %26 = arith.addf %18, %25 : vector<32x128xf32>
    %27 = arith.truncf %26 : vector<32x128xf32> to vector<32x128xbf16>
    %cst_23 = arith.constant 0.000000e+00 : f32
    %28 = vector.broadcast %cst_23 : f32 to vector<16x64xf32>
    %c0_24 = arith.constant 0 : index
    %c0_25 = arith.constant 0 : index
    %c0_26 = arith.constant 0 : index
    %29 = vector.load %arg4[%c0_24, %c0_25, %c0_26] : memref<3x16x32xbf16, #tpu.memory_space<vmem>>, vector<1x16x32xbf16>
    %30 = vector.shape_cast %29 : vector<1x16x32xbf16> to vector<16x32xbf16>
    %cst_27 = arith.constant dense<0.000000e+00> : vector<16x128xf32>
    %31 = tpu.matmul %30, %27, %cst_27 {dimension_numbers = #tpu.dot_dimension_numbers<[1], [0], [0], [1], [0, 0, 1, 1], [], []>} : vector<16x32xbf16>, vector<32x128xbf16>, vector<16x128xf32> -> vector<16x128xf32>
    %32 = arith.truncf %31 : vector<16x128xf32> to vector<16x128xbf16>
    %c0_28 = arith.constant 0 : index
    %c0_29 = arith.constant 0 : index
    %c0_30 = arith.constant 0 : index
    %33 = vector.load %arg5[%c0_28, %c0_29, %c0_30] : memref<3x128x64xbf16, #tpu.memory_space<vmem>>, vector<1x128x64xbf16>
    %34 = vector.shape_cast %33 : vector<1x128x64xbf16> to vector<128x64xbf16>
    %cst_31 = arith.constant dense<0.000000e+00> : vector<16x64xf32>
    %35 = tpu.matmul %32, %34, %cst_31 {dimension_numbers = #tpu.dot_dimension_numbers<[1], [0], [0], [1], [0, 0, 1, 1], [], []>} : vector<16x128xbf16>, vector<128x64xbf16>, vector<16x64xf32> -> vector<16x64xf32>
    %36 = arith.addf %28, %35 : vector<16x64xf32>
    %c1_32 = arith.constant 1 : index
    %c0_33 = arith.constant 0 : index
    %c0_34 = arith.constant 0 : index
    %37 = vector.load %arg4[%c1_32, %c0_33, %c0_34] : memref<3x16x32xbf16, #tpu.memory_space<vmem>>, vector<1x16x32xbf16>
    %38 = vector.shape_cast %37 : vector<1x16x32xbf16> to vector<16x32xbf16>
    %cst_35 = arith.constant dense<0.000000e+00> : vector<16x128xf32>
    %39 = tpu.matmul %38, %27, %cst_35 {dimension_numbers = #tpu.dot_dimension_numbers<[1], [0], [0], [1], [0, 0, 1, 1], [], []>} : vector<16x32xbf16>, vector<32x128xbf16>, vector<16x128xf32> -> vector<16x128xf32>
    %40 = arith.truncf %39 : vector<16x128xf32> to vector<16x128xbf16>
    %c1_36 = arith.constant 1 : index
    %c0_37 = arith.constant 0 : index
    %c0_38 = arith.constant 0 : index
    %41 = vector.load %arg5[%c1_36, %c0_37, %c0_38] : memref<3x128x64xbf16, #tpu.memory_space<vmem>>, vector<1x128x64xbf16>
    %42 = vector.shape_cast %41 : vector<1x128x64xbf16> to vector<128x64xbf16>
    %cst_39 = arith.constant dense<0.000000e+00> : vector<16x64xf32>
    %43 = tpu.matmul %40, %42, %cst_39 {dimension_numbers = #tpu.dot_dimension_numbers<[1], [0], [0], [1], [0, 0, 1, 1], [], []>} : vector<16x128xbf16>, vector<128x64xbf16>, vector<16x64xf32> -> vector<16x64xf32>
    %44 = arith.addf %36, %43 : vector<16x64xf32>
    %c2_40 = arith.constant 2 : index
    %c0_41 = arith.constant 0 : index
    %c0_42 = arith.constant 0 : index
    %45 = vector.load %arg4[%c2_40, %c0_41, %c0_42] : memref<3x16x32xbf16, #tpu.memory_space<vmem>>, vector<1x16x32xbf16>
    %46 = vector.shape_cast %45 : vector<1x16x32xbf16> to vector<16x32xbf16>
    %cst_43 = arith.constant dense<0.000000e+00> : vector<16x128xf32>
    %47 = tpu.matmul %46, %27, %cst_43 {dimension_numbers = #tpu.dot_dimension_numbers<[1], [0], [0], [1], [0, 0, 1, 1], [], []>} : vector<16x32xbf16>, vector<32x128xbf16>, vector<16x128xf32> -> vector<16x128xf32>
    %48 = arith.truncf %47 : vector<16x128xf32> to vector<16x128xbf16>
    %c2_44 = arith.constant 2 : index
    %c0_45 = arith.constant 0 : index
    %c0_46 = arith.constant 0 : index
    %49 = vector.load %arg5[%c2_44, %c0_45, %c0_46] : memref<3x128x64xbf16, #tpu.memory_space<vmem>>, vector<1x128x64xbf16>
    %50 = vector.shape_cast %49 : vector<1x128x64xbf16> to vector<128x64xbf16>
    %cst_47 = arith.constant dense<0.000000e+00> : vector<16x64xf32>
    %51 = tpu.matmul %48, %50, %cst_47 {dimension_numbers = #tpu.dot_dimension_numbers<[1], [0], [0], [1], [0, 0, 1, 1], [], []>} : vector<16x128xbf16>, vector<128x64xbf16>, vector<16x64xf32> -> vector<16x64xf32>
    %52 = arith.addf %44, %51 : vector<16x64xf32>
    %c0_48 = arith.constant 0 : index
    %c0_49 = arith.constant 0 : index
    %53 = vector.load %arg6[%c0_48, %c0_49] : memref<1x64xf32, #tpu.memory_space<vmem>>, vector<1x64xf32>
    %c0_50 = arith.constant 0 : index
    %c0_51 = arith.constant 0 : index
    %54 = vector.load %arg7[%c0_50, %c0_51] : memref<1x64xf32, #tpu.memory_space<vmem>>, vector<1x64xf32>
    %55 = vector.broadcast %53 : vector<1x64xf32> to vector<16x64xf32>
    %56 = arith.mulf %52, %55 : vector<16x64xf32>
    %57 = vector.broadcast %54 : vector<1x64xf32> to vector<16x64xf32>
    %58 = arith.addf %56, %57 : vector<16x64xf32>
    %cst_52 = arith.constant 0.000000e+00 : f32
    %59 = vector.broadcast %cst_52 : f32 to vector<16x64xf32>
    %60 = arith.maximumf %58, %59 : vector<16x64xf32>
    %61 = arith.truncf %60 : vector<16x64xf32> to vector<16x64xbf16>
    %cst_53 = arith.constant 0.000000e+00 : f32
    %62 = vector.broadcast %cst_53 : f32 to vector<8x64xf32>
    %c0_54 = arith.constant 0 : index
    %c0_55 = arith.constant 0 : index
    %c0_56 = arith.constant 0 : index
    %63 = vector.load %arg8[%c0_54, %c0_55, %c0_56] : memref<3x8x16xbf16, #tpu.memory_space<vmem>>, vector<1x8x16xbf16>
    %64 = vector.shape_cast %63 : vector<1x8x16xbf16> to vector<8x16xbf16>
    %cst_57 = arith.constant dense<0.000000e+00> : vector<8x64xf32>
    %65 = tpu.matmul %64, %61, %cst_57 {dimension_numbers = #tpu.dot_dimension_numbers<[1], [0], [0], [1], [0, 0, 1, 1], [], []>} : vector<8x16xbf16>, vector<16x64xbf16>, vector<8x64xf32> -> vector<8x64xf32>
    %66 = arith.truncf %65 : vector<8x64xf32> to vector<8x64xbf16>
    %c0_58 = arith.constant 0 : index
    %c0_59 = arith.constant 0 : index
    %c0_60 = arith.constant 0 : index
    %67 = vector.load %arg9[%c0_58, %c0_59, %c0_60] : memref<3x64x64xbf16, #tpu.memory_space<vmem>>, vector<1x64x64xbf16>
    %68 = vector.shape_cast %67 : vector<1x64x64xbf16> to vector<64x64xbf16>
    %cst_61 = arith.constant dense<0.000000e+00> : vector<8x64xf32>
    %69 = tpu.matmul %66, %68, %cst_61 {dimension_numbers = #tpu.dot_dimension_numbers<[1], [0], [0], [1], [0, 0, 1, 1], [], []>} : vector<8x64xbf16>, vector<64x64xbf16>, vector<8x64xf32> -> vector<8x64xf32>
    %70 = arith.addf %62, %69 : vector<8x64xf32>
    %c1_62 = arith.constant 1 : index
    %c0_63 = arith.constant 0 : index
    %c0_64 = arith.constant 0 : index
    %71 = vector.load %arg8[%c1_62, %c0_63, %c0_64] : memref<3x8x16xbf16, #tpu.memory_space<vmem>>, vector<1x8x16xbf16>
    %72 = vector.shape_cast %71 : vector<1x8x16xbf16> to vector<8x16xbf16>
    %cst_65 = arith.constant dense<0.000000e+00> : vector<8x64xf32>
    %73 = tpu.matmul %72, %61, %cst_65 {dimension_numbers = #tpu.dot_dimension_numbers<[1], [0], [0], [1], [0, 0, 1, 1], [], []>} : vector<8x16xbf16>, vector<16x64xbf16>, vector<8x64xf32> -> vector<8x64xf32>
    %74 = arith.truncf %73 : vector<8x64xf32> to vector<8x64xbf16>
    %c1_66 = arith.constant 1 : index
    %c0_67 = arith.constant 0 : index
    %c0_68 = arith.constant 0 : index
    %75 = vector.load %arg9[%c1_66, %c0_67, %c0_68] : memref<3x64x64xbf16, #tpu.memory_space<vmem>>, vector<1x64x64xbf16>
    %76 = vector.shape_cast %75 : vector<1x64x64xbf16> to vector<64x64xbf16>
    %cst_69 = arith.constant dense<0.000000e+00> : vector<8x64xf32>
    %77 = tpu.matmul %74, %76, %cst_69 {dimension_numbers = #tpu.dot_dimension_numbers<[1], [0], [0], [1], [0, 0, 1, 1], [], []>} : vector<8x64xbf16>, vector<64x64xbf16>, vector<8x64xf32> -> vector<8x64xf32>
    %78 = arith.addf %70, %77 : vector<8x64xf32>
    %c2_70 = arith.constant 2 : index
    %c0_71 = arith.constant 0 : index
    %c0_72 = arith.constant 0 : index
    %79 = vector.load %arg8[%c2_70, %c0_71, %c0_72] : memref<3x8x16xbf16, #tpu.memory_space<vmem>>, vector<1x8x16xbf16>
    %80 = vector.shape_cast %79 : vector<1x8x16xbf16> to vector<8x16xbf16>
    %cst_73 = arith.constant dense<0.000000e+00> : vector<8x64xf32>
    %81 = tpu.matmul %80, %61, %cst_73 {dimension_numbers = #tpu.dot_dimension_numbers<[1], [0], [0], [1], [0, 0, 1, 1], [], []>} : vector<8x16xbf16>, vector<16x64xbf16>, vector<8x64xf32> -> vector<8x64xf32>
    %82 = arith.truncf %81 : vector<8x64xf32> to vector<8x64xbf16>
    %c2_74 = arith.constant 2 : index
    %c0_75 = arith.constant 0 : index
    %c0_76 = arith.constant 0 : index
    %83 = vector.load %arg9[%c2_74, %c0_75, %c0_76] : memref<3x64x64xbf16, #tpu.memory_space<vmem>>, vector<1x64x64xbf16>
    %84 = vector.shape_cast %83 : vector<1x64x64xbf16> to vector<64x64xbf16>
    %cst_77 = arith.constant dense<0.000000e+00> : vector<8x64xf32>
    %85 = tpu.matmul %82, %84, %cst_77 {dimension_numbers = #tpu.dot_dimension_numbers<[1], [0], [0], [1], [0, 0, 1, 1], [], []>} : vector<8x64xbf16>, vector<64x64xbf16>, vector<8x64xf32> -> vector<8x64xf32>
    %86 = arith.addf %78, %85 : vector<8x64xf32>
    %c0_78 = arith.constant 0 : index
    %c0_79 = arith.constant 0 : index
    %87 = vector.load %arg10[%c0_78, %c0_79] : memref<1x64xf32, #tpu.memory_space<vmem>>, vector<1x64xf32>
    %c0_80 = arith.constant 0 : index
    %c0_81 = arith.constant 0 : index
    %88 = vector.load %arg11[%c0_80, %c0_81] : memref<1x64xf32, #tpu.memory_space<vmem>>, vector<1x64xf32>
    %89 = vector.broadcast %87 : vector<1x64xf32> to vector<8x64xf32>
    %90 = arith.mulf %86, %89 : vector<8x64xf32>
    %91 = vector.broadcast %88 : vector<1x64xf32> to vector<8x64xf32>
    %92 = arith.addf %90, %91 : vector<8x64xf32>
    %cst_82 = arith.constant 0.000000e+00 : f32
    %93 = vector.broadcast %cst_82 : f32 to vector<8x64xf32>
    %94 = arith.maximumf %92, %93 : vector<8x64xf32>
    %95 = arith.truncf %94 : vector<8x64xf32> to vector<8x64xbf16>
    %cst_83 = arith.constant 0.000000e+00 : f32
    %96 = vector.broadcast %cst_83 : f32 to vector<4x64xf32>
    %c0_84 = arith.constant 0 : index
    %c0_85 = arith.constant 0 : index
    %c0_86 = arith.constant 0 : index
    %97 = vector.load %arg12[%c0_84, %c0_85, %c0_86] : memref<3x4x8xbf16, #tpu.memory_space<vmem>>, vector<1x4x8xbf16>
    %98 = vector.shape_cast %97 : vector<1x4x8xbf16> to vector<4x8xbf16>
    %cst_87 = arith.constant dense<0.000000e+00> : vector<4x64xf32>
    %99 = tpu.matmul %98, %95, %cst_87 {dimension_numbers = #tpu.dot_dimension_numbers<[1], [0], [0], [1], [0, 0, 1, 1], [], []>} : vector<4x8xbf16>, vector<8x64xbf16>, vector<4x64xf32> -> vector<4x64xf32>
    %100 = arith.truncf %99 : vector<4x64xf32> to vector<4x64xbf16>
    %c0_88 = arith.constant 0 : index
    %c0_89 = arith.constant 0 : index
    %c0_90 = arith.constant 0 : index
    %101 = vector.load %arg13[%c0_88, %c0_89, %c0_90] : memref<3x64x64xbf16, #tpu.memory_space<vmem>>, vector<1x64x64xbf16>
    %102 = vector.shape_cast %101 : vector<1x64x64xbf16> to vector<64x64xbf16>
    %cst_91 = arith.constant dense<0.000000e+00> : vector<4x64xf32>
    %103 = tpu.matmul %100, %102, %cst_91 {dimension_numbers = #tpu.dot_dimension_numbers<[1], [0], [0], [1], [0, 0, 1, 1], [], []>} : vector<4x64xbf16>, vector<64x64xbf16>, vector<4x64xf32> -> vector<4x64xf32>
    %104 = arith.addf %96, %103 : vector<4x64xf32>
    %c1_92 = arith.constant 1 : index
    %c0_93 = arith.constant 0 : index
    %c0_94 = arith.constant 0 : index
    %105 = vector.load %arg12[%c1_92, %c0_93, %c0_94] : memref<3x4x8xbf16, #tpu.memory_space<vmem>>, vector<1x4x8xbf16>
    %106 = vector.shape_cast %105 : vector<1x4x8xbf16> to vector<4x8xbf16>
    %cst_95 = arith.constant dense<0.000000e+00> : vector<4x64xf32>
    %107 = tpu.matmul %106, %95, %cst_95 {dimension_numbers = #tpu.dot_dimension_numbers<[1], [0], [0], [1], [0, 0, 1, 1], [], []>} : vector<4x8xbf16>, vector<8x64xbf16>, vector<4x64xf32> -> vector<4x64xf32>
    %108 = arith.truncf %107 : vector<4x64xf32> to vector<4x64xbf16>
    %c1_96 = arith.constant 1 : index
    %c0_97 = arith.constant 0 : index
    %c0_98 = arith.constant 0 : index
    %109 = vector.load %arg13[%c1_96, %c0_97, %c0_98] : memref<3x64x64xbf16, #tpu.memory_space<vmem>>, vector<1x64x64xbf16>
    %110 = vector.shape_cast %109 : vector<1x64x64xbf16> to vector<64x64xbf16>
    %cst_99 = arith.constant dense<0.000000e+00> : vector<4x64xf32>
    %111 = tpu.matmul %108, %110, %cst_99 {dimension_numbers = #tpu.dot_dimension_numbers<[1], [0], [0], [1], [0, 0, 1, 1], [], []>} : vector<4x64xbf16>, vector<64x64xbf16>, vector<4x64xf32> -> vector<4x64xf32>
    %112 = arith.addf %104, %111 : vector<4x64xf32>
    %c2_100 = arith.constant 2 : index
    %c0_101 = arith.constant 0 : index
    %c0_102 = arith.constant 0 : index
    %113 = vector.load %arg12[%c2_100, %c0_101, %c0_102] : memref<3x4x8xbf16, #tpu.memory_space<vmem>>, vector<1x4x8xbf16>
    %114 = vector.shape_cast %113 : vector<1x4x8xbf16> to vector<4x8xbf16>
    %cst_103 = arith.constant dense<0.000000e+00> : vector<4x64xf32>
    %115 = tpu.matmul %114, %95, %cst_103 {dimension_numbers = #tpu.dot_dimension_numbers<[1], [0], [0], [1], [0, 0, 1, 1], [], []>} : vector<4x8xbf16>, vector<8x64xbf16>, vector<4x64xf32> -> vector<4x64xf32>
    %116 = arith.truncf %115 : vector<4x64xf32> to vector<4x64xbf16>
    %c2_104 = arith.constant 2 : index
    %c0_105 = arith.constant 0 : index
    %c0_106 = arith.constant 0 : index
    %117 = vector.load %arg13[%c2_104, %c0_105, %c0_106] : memref<3x64x64xbf16, #tpu.memory_space<vmem>>, vector<1x64x64xbf16>
    %118 = vector.shape_cast %117 : vector<1x64x64xbf16> to vector<64x64xbf16>
    %cst_107 = arith.constant dense<0.000000e+00> : vector<4x64xf32>
    %119 = tpu.matmul %116, %118, %cst_107 {dimension_numbers = #tpu.dot_dimension_numbers<[1], [0], [0], [1], [0, 0, 1, 1], [], []>} : vector<4x64xbf16>, vector<64x64xbf16>, vector<4x64xf32> -> vector<4x64xf32>
    %120 = arith.addf %112, %119 : vector<4x64xf32>
    %c0_108 = arith.constant 0 : index
    %c0_109 = arith.constant 0 : index
    %121 = vector.load %arg14[%c0_108, %c0_109] : memref<1x64xf32, #tpu.memory_space<vmem>>, vector<1x64xf32>
    %c0_110 = arith.constant 0 : index
    %c0_111 = arith.constant 0 : index
    %122 = vector.load %arg15[%c0_110, %c0_111] : memref<1x64xf32, #tpu.memory_space<vmem>>, vector<1x64xf32>
    %123 = vector.broadcast %121 : vector<1x64xf32> to vector<4x64xf32>
    %124 = arith.mulf %120, %123 : vector<4x64xf32>
    %125 = vector.broadcast %122 : vector<1x64xf32> to vector<4x64xf32>
    %126 = arith.addf %124, %125 : vector<4x64xf32>
    %cst_112 = arith.constant 0.000000e+00 : f32
    %127 = vector.broadcast %cst_112 : f32 to vector<4x64xf32>
    %128 = arith.maximumf %126, %127 : vector<4x64xf32>
    %129 = arith.truncf %128 : vector<4x64xf32> to vector<4x64xbf16>
    %cst_113 = arith.constant 0.000000e+00 : f32
    %130 = vector.broadcast %cst_113 : f32 to vector<2x32xf32>
    %c0_114 = arith.constant 0 : index
    %c0_115 = arith.constant 0 : index
    %c0_116 = arith.constant 0 : index
    %131 = vector.load %arg16[%c0_114, %c0_115, %c0_116] : memref<3x2x4xbf16, #tpu.memory_space<vmem>>, vector<1x2x4xbf16>
    %132 = vector.shape_cast %131 : vector<1x2x4xbf16> to vector<2x4xbf16>
    %cst_117 = arith.constant dense<0.000000e+00> : vector<2x64xf32>
    %133 = tpu.matmul %132, %129, %cst_117 {dimension_numbers = #tpu.dot_dimension_numbers<[1], [0], [0], [1], [0, 0, 1, 1], [], []>} : vector<2x4xbf16>, vector<4x64xbf16>, vector<2x64xf32> -> vector<2x64xf32>
    %134 = arith.truncf %133 : vector<2x64xf32> to vector<2x64xbf16>
    %c0_118 = arith.constant 0 : index
    %c0_119 = arith.constant 0 : index
    %c0_120 = arith.constant 0 : index
    %135 = vector.load %arg17[%c0_118, %c0_119, %c0_120] : memref<3x64x32xbf16, #tpu.memory_space<vmem>>, vector<1x64x32xbf16>
    %136 = vector.shape_cast %135 : vector<1x64x32xbf16> to vector<64x32xbf16>
    %cst_121 = arith.constant dense<0.000000e+00> : vector<2x32xf32>
    %137 = tpu.matmul %134, %136, %cst_121 {dimension_numbers = #tpu.dot_dimension_numbers<[1], [0], [0], [1], [0, 0, 1, 1], [], []>} : vector<2x64xbf16>, vector<64x32xbf16>, vector<2x32xf32> -> vector<2x32xf32>
    %138 = arith.addf %130, %137 : vector<2x32xf32>
    %c1_122 = arith.constant 1 : index
    %c0_123 = arith.constant 0 : index
    %c0_124 = arith.constant 0 : index
    %139 = vector.load %arg16[%c1_122, %c0_123, %c0_124] : memref<3x2x4xbf16, #tpu.memory_space<vmem>>, vector<1x2x4xbf16>
    %140 = vector.shape_cast %139 : vector<1x2x4xbf16> to vector<2x4xbf16>
    %cst_125 = arith.constant dense<0.000000e+00> : vector<2x64xf32>
    %141 = tpu.matmul %140, %129, %cst_125 {dimension_numbers = #tpu.dot_dimension_numbers<[1], [0], [0], [1], [0, 0, 1, 1], [], []>} : vector<2x4xbf16>, vector<4x64xbf16>, vector<2x64xf32> -> vector<2x64xf32>
    %142 = arith.truncf %141 : vector<2x64xf32> to vector<2x64xbf16>
    %c1_126 = arith.constant 1 : index
    %c0_127 = arith.constant 0 : index
    %c0_128 = arith.constant 0 : index
    %143 = vector.load %arg17[%c1_126, %c0_127, %c0_128] : memref<3x64x32xbf16, #tpu.memory_space<vmem>>, vector<1x64x32xbf16>
    %144 = vector.shape_cast %143 : vector<1x64x32xbf16> to vector<64x32xbf16>
    %cst_129 = arith.constant dense<0.000000e+00> : vector<2x32xf32>
    %145 = tpu.matmul %142, %144, %cst_129 {dimension_numbers = #tpu.dot_dimension_numbers<[1], [0], [0], [1], [0, 0, 1, 1], [], []>} : vector<2x64xbf16>, vector<64x32xbf16>, vector<2x32xf32> -> vector<2x32xf32>
    %146 = arith.addf %138, %145 : vector<2x32xf32>
    %c2_130 = arith.constant 2 : index
    %c0_131 = arith.constant 0 : index
    %c0_132 = arith.constant 0 : index
    %147 = vector.load %arg16[%c2_130, %c0_131, %c0_132] : memref<3x2x4xbf16, #tpu.memory_space<vmem>>, vector<1x2x4xbf16>
    %148 = vector.shape_cast %147 : vector<1x2x4xbf16> to vector<2x4xbf16>
    %cst_133 = arith.constant dense<0.000000e+00> : vector<2x64xf32>
    %149 = tpu.matmul %148, %129, %cst_133 {dimension_numbers = #tpu.dot_dimension_numbers<[1], [0], [0], [1], [0, 0, 1, 1], [], []>} : vector<2x4xbf16>, vector<4x64xbf16>, vector<2x64xf32> -> vector<2x64xf32>
    %150 = arith.truncf %149 : vector<2x64xf32> to vector<2x64xbf16>
    %c2_134 = arith.constant 2 : index
    %c0_135 = arith.constant 0 : index
    %c0_136 = arith.constant 0 : index
    %151 = vector.load %arg17[%c2_134, %c0_135, %c0_136] : memref<3x64x32xbf16, #tpu.memory_space<vmem>>, vector<1x64x32xbf16>
    %152 = vector.shape_cast %151 : vector<1x64x32xbf16> to vector<64x32xbf16>
    %cst_137 = arith.constant dense<0.000000e+00> : vector<2x32xf32>
    %153 = tpu.matmul %150, %152, %cst_137 {dimension_numbers = #tpu.dot_dimension_numbers<[1], [0], [0], [1], [0, 0, 1, 1], [], []>} : vector<2x64xbf16>, vector<64x32xbf16>, vector<2x32xf32> -> vector<2x32xf32>
    %154 = arith.addf %146, %153 : vector<2x32xf32>
    %c0_138 = arith.constant 0 : index
    %c0_139 = arith.constant 0 : index
    %155 = vector.load %arg18[%c0_138, %c0_139] : memref<1x32xf32, #tpu.memory_space<vmem>>, vector<1x32xf32>
    %c0_140 = arith.constant 0 : index
    %c0_141 = arith.constant 0 : index
    %156 = vector.load %arg19[%c0_140, %c0_141] : memref<1x32xf32, #tpu.memory_space<vmem>>, vector<1x32xf32>
    %157 = vector.broadcast %155 : vector<1x32xf32> to vector<2x32xf32>
    %158 = arith.mulf %154, %157 : vector<2x32xf32>
    %159 = vector.broadcast %156 : vector<1x32xf32> to vector<2x32xf32>
    %160 = arith.addf %158, %159 : vector<2x32xf32>
    %cst_142 = arith.constant 0.000000e+00 : f32
    %161 = vector.broadcast %cst_142 : f32 to vector<2x32xf32>
    %162 = arith.maximumf %160, %161 : vector<2x32xf32>
    %c0_143 = arith.constant 0 : index
    %c0_144 = arith.constant 0 : index
    %163 = vector.load %arg20[%c0_143, %c0_144] : memref<32x8xbf16, #tpu.memory_space<vmem>>, vector<32x8xbf16>
    %c0_145 = arith.constant 0 : index
    %c0_146 = arith.constant 0 : index
    %164 = vector.load %arg21[%c0_145, %c0_146] : memref<1x8xf32, #tpu.memory_space<vmem>>, vector<1x8xf32>
    %c0_147 = arith.constant 0 : index
    %c0_148 = arith.constant 0 : index
    %165 = vector.load %arg22[%c0_147, %c0_148] : memref<1x8xf32, #tpu.memory_space<vmem>>, vector<1x8xf32>
    %c0_149 = arith.constant 0 : index
    %c0_150 = arith.constant 0 : index
    %166 = vector.load %arg23[%c0_149, %c0_150] : memref<1x8xf32, #tpu.memory_space<vmem>>, vector<1x8xf32>
    %167 = arith.truncf %162 : vector<2x32xf32> to vector<2x32xbf16>
    %cst_151 = arith.constant dense<0.000000e+00> : vector<2x8xf32>
    %168 = tpu.matmul %167, %163, %cst_151 {dimension_numbers = #tpu.dot_dimension_numbers<[1], [0], [0], [1], [0, 0, 1, 1], [], []>} : vector<2x32xbf16>, vector<32x8xbf16>, vector<2x8xf32> -> vector<2x8xf32>
    %169 = vector.broadcast %164 : vector<1x8xf32> to vector<2x8xf32>
    %170 = arith.addf %168, %169 : vector<2x8xf32>
    %171 = vector.broadcast %165 : vector<1x8xf32> to vector<2x8xf32>
    %172 = arith.maximumf %170, %171 : vector<2x8xf32>
    %173 = vector.broadcast %166 : vector<1x8xf32> to vector<2x8xf32>
    %174 = arith.minimumf %172, %173 : vector<2x8xf32>
    %c0_152 = arith.constant 0 : index
    %c0_153 = arith.constant 0 : index
    %175 = vector.load %arg24[%c0_152, %c0_153] : memref<2x8xf32, #tpu.memory_space<vmem>>, vector<2x8xf32>
    tpu.vector_store %arg24[%c0_152, %c0_153], %174 {strides = array<i32>} : memref<2x8xf32, #tpu.memory_space<vmem>>, vector<2x8xf32>,
    return
  }
  func.func @transform_0(%arg0: i32) -> (i32, i32) {
    %c0_i32 = arith.constant 0 : i32
    %c0_i32_0 = arith.constant 0 : i32
    %c0_i32_1 = arith.constant 0 : i32
    return %c0_i32, %c0_i32_0 : i32, i32
  }
  func.func @transform_1(%arg0: i32) -> (i32, i32, i32) {
    %c0_i32 = arith.constant 0 : i32
    %c0_i32_0 = arith.constant 0 : i32
    %c0_i32_1 = arith.constant 0 : i32
    %c0_i32_2 = arith.constant 0 : i32
    return %c0_i32, %c0_i32_0, %c0_i32_1 : i32, i32, i32
  }
  func.func @transform_2(%arg0: i32) -> (i32, i32, i32) {
    %c0_i32 = arith.constant 0 : i32
    %c0_i32_0 = arith.constant 0 : i32
    %c0_i32_1 = arith.constant 0 : i32
    %c0_i32_2 = arith.constant 0 : i32
    return %c0_i32, %c0_i32_0, %c0_i32_1 : i32, i32, i32
  }
  func.func @transform_3(%arg0: i32) -> (i32, i32, i32) {
    %c0_i32 = arith.constant 0 : i32
    %c0_i32_0 = arith.constant 0 : i32
    %c0_i32_1 = arith.constant 0 : i32
    %c0_i32_2 = arith.constant 0 : i32
    return %c0_i32, %c0_i32_0, %c0_i32_1 : i32, i32, i32
  }
  func.func @transform_4(%arg0: i32) -> (i32, i32, i32) {
    %c0_i32 = arith.constant 0 : i32
    %c0_i32_0 = arith.constant 0 : i32
    %c0_i32_1 = arith.constant 0 : i32
    %c0_i32_2 = arith.constant 0 : i32
    return %c0_i32, %c0_i32_0, %c0_i32_1 : i32, i32, i32
  }
  func.func @transform_5(%arg0: i32) -> (i32, i32) {
    %c0_i32 = arith.constant 0 : i32
    %c0_i32_0 = arith.constant 0 : i32
    %c0_i32_1 = arith.constant 0 : i32
    return %c0_i32, %c0_i32_0 : i32, i32
  }
  func.func @transform_6(%arg0: i32) -> (i32, i32) {
    %c0_i32 = arith.constant 0 : i32
    %c0_i32_0 = arith.constant 0 : i32
    %c0_i32_1 = arith.constant 0 : i32
    return %c0_i32, %c0_i32_0 : i32, i32
  }
  func.func @transform_7(%arg0: i32) -> (i32, i32, i32) {
    %c0_i32 = arith.constant 0 : i32
    %c0_i32_0 = arith.constant 0 : i32
    %c0_i32_1 = arith.constant 0 : i32
    %c0_i32_2 = arith.constant 0 : i32
    return %c0_i32, %c0_i32_0, %c0_i32_1 : i32, i32, i32
  }
  func.func @transform_8(%arg0: i32) -> (i32, i32, i32) {
    %c0_i32 = arith.constant 0 : i32
    %c0_i32_0 = arith.constant 0 : i32
    %c0_i32_1 = arith.constant 0 : i32
    %c0_i32_2 = arith.constant 0 : i32
    return %c0_i32, %c0_i32_0, %c0_i32_1 : i32, i32, i32
  }
  func.func @transform_9(%arg0: i32) -> (i32, i32) {
    %c0_i32 = arith.constant 0 : i32
    %c0_i32_0 = arith.constant 0 : i32
    %c0_i32_1 = arith.constant 0 : i32
    return %c0_i32, %c0_i32_0 : i32, i32
  }
  func.func @transform_10(%arg0: i32) -> (i32, i32) {
    %c0_i32 = arith.constant 0 : i32
    %c0_i32_0 = arith.constant 0 : i32
    %c0_i32_1 = arith.constant 0 : i32
    return %c0_i32, %c0_i32_0 : i32, i32
  }
  func.func @transform_11(%arg0: i32) -> (i32, i32, i32) {
    %c0_i32 = arith.constant 0 : i32
    %c0_i32_0 = arith.constant 0 : i32
    %c0_i32_1 = arith.constant 0 : i32
    %c0_i32_2 = arith.constant 0 : i32
    return %c0_i32, %c0_i32_0, %c0_i32_1 : i32, i32, i32
  }
  func.func @transform_12(%arg0: i32) -> (i32, i32, i32) {
    %c0_i32 = arith.constant 0 : i32
    %c0_i32_0 = arith.constant 0 : i32
    %c0_i32_1 = arith.constant 0 : i32
    %c0_i32_2 = arith.constant 0 : i32
    return %c0_i32, %c0_i32_0, %c0_i32_1 : i32, i32, i32
  }
  func.func @transform_13(%arg0: i32) -> (i32, i32) {
    %c0_i32 = arith.constant 0 : i32
    %c0_i32_0 = arith.constant 0 : i32
    %c0_i32_1 = arith.constant 0 : i32
    return %c0_i32, %c0_i32_0 : i32, i32
  }
  func.func @transform_14(%arg0: i32) -> (i32, i32) {
    %c0_i32 = arith.constant 0 : i32
    %c0_i32_0 = arith.constant 0 : i32
    %c0_i32_1 = arith.constant 0 : i32
    return %c0_i32, %c0_i32_0 : i32, i32
  }
  func.func @transform_15(%arg0: i32) -> (i32, i32, i32) {
    %c0_i32 = arith.constant 0 : i32
    %c0_i32_0 = arith.constant 0 : i32
    %c0_i32_1 = arith.constant 0 : i32
    %c0_i32_2 = arith.constant 0 : i32
    return %c0_i32, %c0_i32_0, %c0_i32_1 : i32, i32, i32
  }
  func.func @transform_16(%arg0: i32) -> (i32, i32, i32) {
    %c0_i32 = arith.constant 0 : i32
    %c0_i32_0 = arith.constant 0 : i32
    %c0_i32_1 = arith.constant 0 : i32
    %c0_i32_2 = arith.constant 0 : i32
    return %c0_i32, %c0_i32_0, %c0_i32_1 : i32, i32, i32
  }
  func.func @transform_17(%arg0: i32) -> (i32, i32) {
    %c0_i32 = arith.constant 0 : i32
    %c0_i32_0 = arith.constant 0 : i32
    %c0_i32_1 = arith.constant 0 : i32
    return %c0_i32, %c0_i32_0 : i32, i32
  }
  func.func @transform_18(%arg0: i32) -> (i32, i32) {
    %c0_i32 = arith.constant 0 : i32
    %c0_i32_0 = arith.constant 0 : i32
    %c0_i32_1 = arith.constant 0 : i32
    return %c0_i32, %c0_i32_0 : i32, i32
  }
  func.func @transform_19(%arg0: i32) -> (i32, i32) {
    %c0_i32 = arith.constant 0 : i32
    %c0_i32_0 = arith.constant 0 : i32
    %c0_i32_1 = arith.constant 0 : i32
    return %c0_i32, %c0_i32_0 : i32, i32
  }
  func.func @transform_20(%arg0: i32) -> (i32, i32) {
    %c0_i32 = arith.constant 0 : i32
    %c0_i32_0 = arith.constant 0 : i32
    %c0_i32_1 = arith.constant 0 : i32
    return %c0_i32, %c0_i32_0 : i32, i32
  }
  func.func @transform_21(%arg0: i32) -> (i32, i32) {
    %c0_i32 = arith.constant 0 : i32
    %c0_i32_0 = arith.constant 0 : i32
    %c0_i32_1 = arith.constant 0 : i32
    return %c0_i32, %c0_i32_0 : i32, i32
  }
  func.func @transform_22(%arg0: i32) -> (i32, i32) {
    %c0_i32 = arith.constant 0 : i32
    %c0_i32_0 = arith.constant 0 : i32
    %c0_i32_1 = arith.constant 0 : i32
    return %c0_i32, %c0_i32_0 : i32, i32
  }
  func.func @transform_23(%arg0: i32) -> (i32, i32) {
    %c0_i32 = arith.constant 0 : i32
    %c0_i32_0 = arith.constant 0 : i32
    %c0_i32_1 = arith.constant 0 : i32
    return %c0_i32, %c0_i32_0 : i32, i32
  }
}

</mosaic_0001>

<bundles_post_ra>
// kernel: offset_net_v2_forward.1
= control target key start
LH: loop header
LB: loop body
LE: loop exit
PB: predicated region body
PF: predicated region fallthrough
CT: control target
= control target key end

     0   :  { %s3669_s0 = inlined_call_operand.vmem [shape: f32[32,32], index: 0, kind: input, shape index: {}]   ;;  %s3670_s1 = inlined_call_operand.vmem [shape: bf16[3,32,32], index: 1, kind: input, shape index: {}]   ;;  %s3671_s2 = inlined_call_operand.vmem [shape: bf16[3,32,128], index: 2, kind: input, shape index: {}]   ;;  %s3672_s3 = inlined_call_operand.vmem [shape: bf16[3,16,32], index: 3, kind: input, shape index: {}]   ;;  %s3673_s4 = inlined_call_operand.vmem [shape: bf16[3,128,64], index: 4, kind: input, shape index: {}]   ;;  %s3674_s5 = inlined_call_operand.vmem [shape: f32[1,64], index: 5, kind: input, shape index: {}]   ;;  %s3675_s6 = inlined_call_operand.vmem [shape: f32[1,64], index: 6, kind: input, shape index: {}]   ;;  %s3676_s7 = inlined_call_operand.vmem [shape: bf16[3,8,16], index: 7, kind: input, shape index: {}]   ;;  %s3677_s8 = inlined_call_operand.vmem [shape: bf16[3,64,64], index: 8, kind: input, shape index: {}]   ;;  %s3678_s9 = inlined_call_operand.vmem [shape: f32[1,64], index: 9, kind: input, shape index: {}]   ;;  %s3679_s10 = inlined_call_operand.vmem [shape: f32[1,64], index: 10, kind: input, shape index: {}]   ;;  %s3680_s11 = inlined_call_operand.vmem [shape: bf16[3,4,8], index: 11, kind: input, shape index: {}]   ;;  %s3681_s12 = inlined_call_operand.vmem [shape: bf16[3,64,64], index: 12, kind: input, shape index: {}]   ;;  %s3682_s13 = inlined_call_operand.vmem [shape: f32[1,64], index: 13, kind: input, shape index: {}]   ;;  %s3683_s14 = inlined_call_operand.vmem [shape: f32[1,64], index: 14, kind: input, shape index: {}]   ;;  %s3684_s15 = inlined_call_operand.vmem [shape: bf16[3,2,4], index: 15, kind: input, shape index: {}]   ;;  %s3685_s16 = inlined_call_operand.vmem [shape: bf16[3,64,32], index: 16, kind: input, shape index: {}]   ;;  %s3686_s17 = inlined_call_operand.vmem [shape: f32[1,32], index: 17, kind: input, shape index: {}]   ;;  %s3687_s18 = inlined_call_operand.vmem [shape: f32[1,32], index: 18, kind: input, shape index: {}]   ;;  %s3688_s19 = inlined_call_operand.vmem [shape: bf16[32,8], index: 19, kind: input, shape index: {}]   ;;  %s3689_s20 = inlined_call_operand.vmem [shape: f32[1,8], index: 20, kind: input, shape index: {}]   ;;  %s3690_s21 = inlined_call_operand.vmem [shape: f32[1,8], index: 21, kind: input, shape index: {}]   ;;  %s3691_s22 = inlined_call_operand.vmem [shape: f32[1,8], index: 22, kind: input, shape index: {}]   ;;  %s3692_s23 = inlined_call_operand.hbm [shape: f32[2,8], index: 23, kind: output, shape index: {}]  }
   0x1   :  { %3699 = sst [smem:[#allocation5_spill]] %s3669_s0 }
   0x2   :  { %3700 = sst [smem:[#allocation6_spill]] %s3670_s1 }
   0x3   :  { %3701 = sst [smem:[#allocation7_spill]] %s3671_s2 }
   0x4   :  { %3702 = sst [smem:[#allocation8_spill]] %s3672_s3 }
   0x5   :  { %3703 = sst [smem:[#allocation9_spill]] %s3673_s4 }
   0x6   :  { %3704 = sst [smem:[#allocation10_spill]] %s3674_s5 }
   0x7   :  { %3705 = sst [smem:[#allocation11_spill]] %s3675_s6 }
   0x8   :  { %3706 = sst [smem:[#allocation12_spill]] %s3676_s7 }
   0x9   :  { %s3707_s24 = sld [smem:[#allocation5_spill]]  ;;  %vm96_vm0 = vcmask 261120   ;;  %s3708_s28 = sld [smem:[#allocation6_spill]] }
   0xa   :  { %s3709_s2 = sld [smem:[#allocation7_spill]] }
   0xf   :  { %v76_v0 = vld [vmem:[%s3707_s24] sm:$0xff]  ;;  %v77_v1 = vld [vmem:[%s3707_s24 + $0x8] sm:$0xff]  ;;  %v78_v2 = vld [vmem:[%s3707_s24 + $0x10] sm:$0xff] }
  0x10   :  { %v80_v3 = vpack.c.bf16 %v77_v1, %v76_v0  ;;  %v79_v4 = vld [vmem:[%s3707_s24 + $0x18] sm:$0xff]  ;;  %v2975_v6 = vld [vmem:[%s3708_s28 + $0x10] sm:$0xff]   ;;  %v2977_v7 = vld [vmem:[%s3708_s28] sm:$0xff]  }
  0x11   :  { %v81_v5 = vpack.c.bf16 %v79_v4, %v78_v2  ;;  %2642 = vmatprep.mubr.msk.bf16.mxu1 %vm96_vm0, %v2975_v6  ;;  %v2976_v8 = vld [vmem:[%s3708_s28 + $0x18] sm:$0xff]   ;;  %2634 = vmatprep.mubr.msk.bf16.mxu0 %vm96_vm0, %v2977_v7  ;;  %v2978_v9 = vld [vmem:[%s3708_s28 + $0x8] sm:$0xff]   ;;  %v2979_v10 = vld [vmem:[%s3708_s28 + $0x20] sm:$0xff]  }
  0x12   :  { %2638 = vmatprep.subr.bf16.mxu1 %v80_v3  ;;  %2630 = vmatprep.subr.bf16.mxu0 %v80_v3  ;;  %v2981_v11 = vld [vmem:[%s3709_s2 + $0x10] sm:$0xff]   ;;  %v2980_v12 = vld [vmem:[%s3708_s28 + $0x28] sm:$0xff]  }
  0x13   :  { %2639 = vmatpush3.bf16.msra.mxu1 %v80_v3  ;;  %2631 = vmatpush3.bf16.msra.mxu0 %v80_v3 }
  0x14   :  { %2640 = vmatprep.subr.bf16.mxu1 %v81_v5  ;;  %2632 = vmatprep.subr.bf16.mxu0 %v81_v5 }
  0x17   :  { %2641 = vmatpush3.bf16.msra.mxu1 %v81_v5  ;;  %2633 = vmatpush3.bf16.msra.mxu0 %v81_v5 }
  0x18   :  { %2662 = vmatprep.subr.bf16.mxu1 %v80_v3  ;;  %2646 = vmatprep.subr.bf16.mxu0 %v2981_v11 }
  0x1a   :  { %2643 = vmatmul.mubr.msk.bf16.vlgmr.msra.gmra.mrb[0].mxu1 %vm96_vm0, %v2976_v8  ;;  %2635 = vmatmul.mubr.msk.bf16.vlgmr.msra.gmra.mrb[0].mxu0 %vm96_vm0, %v2978_v9 }
  0x1b   :  { %2663 = vmatpush3.bf16.msra.mxu1 %v80_v3  ;;  %2666 = vmatprep.mubr.msk.bf16.mxu1 %vm96_vm0, %v2979_v10 }
  0x1c   :  { %2664 = vmatprep.subr.bf16.mxu1 %v81_v5  ;;  %2647 = vmatpush3.bf16.msra.mxu0 %v2981_v11 }
  0x1f   :  { %2665 = vmatpush3.bf16.msra.mxu1 %v81_v5 }
  0x22   :  { %2667 = vmatmul.mubr.msk.bf16.vlgmr.msra.gmra.mrb[4].mxu1 %vm96_vm0, %v2980_v12 }
  0x23   :  { %28 = vsyncpa [#allocation3], 0  ;;  %v2982_v13 = vld [vmem:[%s3709_s2 + $0x18] sm:$0xff]   ;;  %v2983_v14 = vld [vmem:[%s3709_s2] sm:$0xff]   ;;  %v3076_v36 = vmov 0.0   ;;  %vm3077_vm1 = vmmov 0  }
  0x24   :  { %2648 = vmatprep.subr.bf16.mxu0 %v2982_v13  ;;  %v2984_v27 = vld [vmem:[%s3709_s2 + $0x8] sm:$0xff]   ;;  %v2985_v30 = vld [vmem:[%s3709_s2 + $0x20] sm:$0xff]   ;;  %2678 = vmatprep.subr.bf16.mxu1 %v3076_v36  ;;  %s3711_s25 = sld [smem:[#allocation8_spill]]  ;;  %s3712_s26 = sld [smem:[#allocation10_spill]]  ;;  %vm1018_vm2 = vcmask 130048   ;;  %vm1150_vm3 = vcmask 523264  }
  0x25   :  { %2649 = vmatpush3.bf16.msra.mxu0 %v2982_v13  ;;  %v2986_v35 = vld [vmem:[%s3709_s2 + $0x28] sm:$0xff]   ;;  %2682 = vmatprep.mubr.msk.bf16.mxu1 %vm3077_vm1, %v3076_v36  ;;  %s3710_s2 = sld [smem:[#allocation9_spill]]  ;;  %s3713_s7 = sld [smem:[#allocation11_spill]]  ;;  %vm1407_vm4 = vcmask 1043456   ;;  %vm1403_vm5 = vcmask 64512   ;;  %vm1795_vm6 = vcmask 1041408  }
  0x26   :  { %2654 = vmatprep.subr.bf16.mxu0 %v2983_v14  ;;  %s3714_s3 = sld [smem:[#allocation12_spill]]  ;;  %vm1791_vm7 = vcmask 31744   ;;  %s3078_s6 = smov [#allocation2]   ;;  %vm2260_vm8 = vcmask 58368  }
  0x27   :  { %s2268_s27 = sshll.u32 %s3078_s6, 4  ;;  %s2269_s27 = int_to_ptr.vmem [resolvable:$true] %s2268_s27 }
  0x28   :  { %p3057_p1 = scmp.lt.s32.totalorder %s2269_s27, %s2269_s27 }
  0x2a   :  { %v2987_v48 = vld [vmem:[%s3711_s25] sm:$0xff]   ;;  %v2988_v49 = vld [vmem:[%s3711_s25 + $0x8] sm:$0xff]   ;;  %v2989_v50 = vld [vmem:[%s3711_s25 + $0x10] sm:$0xff]  }
  0x2b   :  { %v2990_v37 = vld [vmem:[%s3710_s2 + $0x40] sm:$0xff]   ;;  %v2991_v38 = vld [vmem:[%s3710_s2 + $0x48] sm:$0xff]   ;;  %v2992_v39 = vld [vmem:[%s3710_s2 + $0x50] sm:$0xff]  }
  0x2c   :  { %v2993_v40 = vld [vmem:[%s3710_s2 + $0x58] sm:$0xff]   ;;  %v2994_v41 = vld [vmem:[%s3710_s2 + $0x60] sm:$0xff]   ;;  %v2995_v51 = vld [vmem:[%s3710_s2 + $0x68] sm:$0xff]  }
  0x2d   :  { %v2996_v52 = vld [vmem:[%s3710_s2 + $0x70] sm:$0xff]   ;;  %v2997_v53 = vld [vmem:[%s3710_s2 + $0x78] sm:$0xff]   ;;  %v2998_v62 = vld [vmem:[%s3710_s2] sm:$0xff]  }
  0x2e   :  { %v2999_v1 = vld [vmem:[%s3710_s2 + $0x8] sm:$0xff]   ;;  %v3000_v4 = vld [vmem:[%s3710_s2 + $0x10] sm:$0xff]   ;;  %v3001_v8 = vld [vmem:[%s3710_s2 + $0x18] sm:$0xff]  }
  0x2f   :  { %v3002_v9 = vld [vmem:[%s3710_s2 + $0x20] sm:$0xff]   ;;  %v3003_v10 = vld [vmem:[%s3710_s2 + $0x28] sm:$0xff]   ;;  %v3004_v11 = vld [vmem:[%s3710_s2 + $0x30] sm:$0xff]  }
  0x30   :  { %v3005_v12 = vld [vmem:[%s3710_s2 + $0x38] sm:$0xff]   ;;  %v3006_v13 = vld [vmem:[%s3710_s2 + $0x80] sm:$0xff]  }
  0xed   :  { %v2644_v15 = vpop.f32.mrb[0].mxu1  ;;  %v2636_v17 = vpop.f32.mrb[0].mxu0 }
  0xee   :  { %v213_v16 = vpop.f32.mrb[1].mxu1  ;;  %v137_v19 = vpop.f32.mrb[1].mxu0 }
  0xef   :  { %v2645_v18 = vpop.f32.mrb[2].mxu1  ;;  %v2637_v22 = vpop.f32.mrb[2].mxu0 }
  0xf0   :  { %v229_v20 = vpack.c.bf16 %v2645_v18, %v2644_v15  ;;  %v216_v21 = vpop.f32.mrb[3].mxu1  ;;  %v153_v24 = vpack.c.bf16 %v2637_v22, %v2636_v17  ;;  %v140_v25 = vpop.f32.mrb[3].mxu0  ;;  %v3008_v15 = vld [vmem:[%s3710_s2 + $0x90] sm:$0xff]   ;;  %v3010_v17 = vld [vmem:[%s3710_s2 + $0xa0] sm:$0xff]   ;;  %v3011_v18 = vld [vmem:[%s3710_s2 + $0xa8] sm:$0xff]  }
  0xf1   :  { %v228_v23 = vpack.c.bf16 %v216_v21, %v213_v16  ;;  %v152_v26 = vpack.c.bf16 %v140_v25, %v137_v19  ;;  %v3009_v16 = vld [vmem:[%s3710_s2 + $0x98] sm:$0xff]   ;;  %v3012_v19 = vld [vmem:[%s3710_s2 + $0xb0] sm:$0xff]   ;;  %v2382_v21 = vld [vmem:[%s3712_s26] ss:$0 sm:$0xff] }
  0xf3   :  { %2650 = vmatprep.mubr.msk.bf16.mxu0 %vm96_vm0, %v228_v23  ;;  %v2383_v23 = vld [vmem:[%s3713_s7] ss:$0 sm:$0xff] }
  0xf4   :  { %2651 = vmatmul.mubr.msk.bf16.vlgmr.msra.gmra.mrb[4].mxu0 %vm96_vm0, %v229_v20  ;;  %v3013_v20 = vld [vmem:[%s3710_s2 + $0xb8] sm:$0xff]  }
  0xf5   :  { %2655 = vmatpush3.bf16.msra.mxu0 %v2983_v14  ;;  %2658 = vmatprep.mubr.msk.bf16.mxu0 %vm96_vm0, %v152_v26  ;;  %v2668_v28 = vpop.f32.mrb[4].mxu1  ;;  %v3007_v14 = vld [vmem:[%s3710_s2 + $0x88] sm:$0xff]  }
  0xf6   :  { %2656 = vmatprep.subr.bf16.mxu0 %v2984_v27  ;;  %v424_v29 = vpop.f32.mrb[5].mxu1 }
  0xf7   :  { %v2669_v31 = vpop.f32.mrb[6].mxu1 }
  0xf8   :  { %v440_v32 = vpack.c.bf16 %v2669_v31, %v2668_v28  ;;  %v427_v33 = vpop.f32.mrb[7].mxu1 }
  0xf9   :  { %2657 = vmatpush3.bf16.msra.mxu0 %v2984_v27  ;;  %v439_v34 = vpack.c.bf16 %v427_v33, %v424_v29 }
  0xfa   :  { %2670 = vmatprep.subr.bf16.mxu0 %v2985_v30 }
 0x100   :  { %2659 = vmatmul.mubr.msk.bf16.vlgmr.msra.gmra.mrb[4].mxu0 %vm96_vm0, %v153_v24 }
 0x101   :  { %2671 = vmatpush3.bf16.msra.mxu0 %v2985_v30  ;;  %2674 = vmatprep.mubr.msk.bf16.mxu0 %vm96_vm0, %v439_v34  ;;  %v1017_v34 = vld [vmem:[%s3714_s3] sm:$0xf] }
 0x102   :  { %2672 = vmatprep.subr.bf16.mxu0 %v2986_v35 }
 0x105   :  { %2673 = vmatpush3.bf16.msra.mxu0 %v2986_v35  ;;  %v2385_v35 = vld [vmem:[%s3714_s3 + $0x4] sm:$0xf] }
 0x106   :  { %2694 = vmatprep.subr.bf16.mxu0 %v3076_v36 }
 0x10c   :  { %2675 = vmatmul.mubr.msk.bf16.vlgmr.msra.gmra.mrb[4].mxu0 %vm96_vm0, %v440_v32 }
 0x10d   :  { %2710 = vmatprep.mubr.msk.bf16.mxu0 %vm3077_vm1, %v3076_v36  ;;  %2695 = vmatpush3.bf16.msra.mxu0 %v2990_v37  ;;  %v3014_v37 = vld [vmem:[%s3677_s8 + $0x20] sm:$0xff]  }
 0x10e   :  { %2696 = vmatprep.subr.bf16.mxu0 %v3076_v36 }
 0x111   :  { %2697 = vmatpush3.bf16.msra.mxu0 %v2991_v38  ;;  %v3015_v38 = vld [vmem:[%s3677_s8 + $0x28] sm:$0xff]  }
 0x112   :  { %2698 = vmatprep.subr.bf16.mxu0 %v3076_v36 }
 0x115   :  { %2699 = vmatpush3.bf16.msra.mxu0 %v2992_v39  ;;  %v3016_v39 = vld [vmem:[%s3677_s8 + $0x30] sm:$0xff]  }
 0x116   :  { %2700 = vmatprep.subr.bf16.mxu0 %v3076_v36 }
 0x119   :  { %2701 = vmatpush3.bf16.msra.mxu0 %v2993_v40  ;;  %v3017_v40 = vld [vmem:[%s3677_s8 + $0x38] sm:$0xff]  }
 0x11a   :  { %2702 = vmatprep.subr.bf16.mxu0 %v3076_v36 }
 0x11d   :  { %2703 = vmatpush3.bf16.msra.mxu0 %v2994_v41 }
 0x11e   :  { %2704 = vmatprep.subr.bf16.mxu0 %v3076_v36 }
 0x121   :  { %2705 = vmatpush3.bf16.msra.mxu0 %v2995_v51  ;;  %v3019_v51 = vld [vmem:[%s3677_s8 + $0x8] sm:$0xff]  }
 0x122   :  { %2706 = vmatprep.subr.bf16.mxu0 %v3076_v36 }
 0x125   :  { %2707 = vmatpush3.bf16.msra.mxu0 %v2996_v52  ;;  %v3020_v52 = vld [vmem:[%s3677_s8 + $0x10] sm:$0xff]  }
 0x126   :  { %2708 = vmatprep.subr.bf16.mxu0 %v3076_v36 }
 0x129   :  { %2709 = vmatpush3.bf16.msra.mxu0 %v2997_v53  ;;  %v3021_v53 = vld [vmem:[%s3677_s8 + $0x18] sm:$0xff]  }
 0x12a   :  { %2714 = vmatprep.subr.bf16.mxu0 %v3076_v36 }
 0x1df   :  { %v2676_v42 = vpop.f32.mrb[4].mxu0 }
 0x1e0   :  { %v498_v43 = vpop.f32.mrb[5].mxu0 }
 0x1e1   :  { %v2677_v44 = vpop.f32.mrb[6].mxu0 }
 0x1e2   :  { %v518_v45 = vpack.c.bf16 %v2677_v44, %v2676_v42  ;;  %v501_v46 = vpop.f32.mrb[7].mxu0 }
 0x1e3   :  { %v517_v47 = vpack.c.bf16 %v501_v46, %v498_v43  ;;  %v3018_v46 = vld [vmem:[%s3677_s8] sm:$0xff]  }
 0x1e5   :  { %2679 = vmatpush3.bf16.msra.mxu1 %v517_v47 }
 0x1e6   :  { %2680 = vmatprep.subr.bf16.mxu1 %v3076_v36 }
 0x1e9   :  { %2681 = vmatpush3.bf16.msra.mxu1 %v518_v45 }
 0x1ea   :  { %2686 = vmatprep.subr.bf16.mxu1 %v3076_v36 }
 0x1ec   :  { %2683 = vmatmul.mubr.msk.bf16.vlgmr.msra.gmra.mrb[8].mxu1 %vm96_vm0, %v2987_v48 }
 0x1ed   :  { %2687 = vmatpush3.bf16.msra.mxu1 %v517_v47  ;;  %2690 = vmatprep.mubr.msk.bf16.mxu1 %vm3077_vm1, %v3076_v36 }
 0x1ee   :  { %2688 = vmatprep.subr.bf16.mxu1 %v3076_v36 }
 0x1f1   :  { %2689 = vmatpush3.bf16.msra.mxu1 %v518_v45 }
 0x1f2   :  { %2734 = vmatprep.subr.bf16.mxu1 %v3076_v36 }
 0x1f4   :  { %2691 = vmatmul.mubr.msk.bf16.vlgmr.msra.gmra.mrb[12].mxu1 %vm96_vm0, %v2988_v49 }
 0x1f5   :  { %2735 = vmatpush3.bf16.msra.mxu1 %v517_v47  ;;  %2738 = vmatprep.mubr.msk.bf16.mxu1 %vm3077_vm1, %v3076_v36 }
 0x1f6   :  { %2736 = vmatprep.subr.bf16.mxu1 %v3076_v36 }
 0x1f9   :  { %2737 = vmatpush3.bf16.msra.mxu1 %v518_v45 }
 0x1fa   :  { %2762 = vmatprep.subr.bf16.mxu1 %v3076_v36 }
 0x1fc   :  { %2739 = vmatmul.mubr.msk.bf16.vlgmr.msra.gmra.mrb[16].mxu1 %vm96_vm0, %v2989_v50 }
 0x1fd   :  { %2764 = vmatprep.mubr.msk.bf16.mxu1 %vm3077_vm1, %v3076_v36 }
 0x2bf   :  { %v563_v54 = vpop.f32.mrb[8].mxu1 }
 0x2c0   :  { %v2684_v55 = vpop.f32.mrb[9].mxu1 }
 0x2c1   :  { %v566_v56 = vpop.f32.mrb[10].mxu1  ;;  %v2405_v55 = vld [vmem:[%s3714_s3 + $0x8] sm:$0xf] }
 0x2c2   :  { %v570_v57 = vpack.c.bf16 %v566_v56, %v563_v54  ;;  %v2685_v58 = vpop.f32.mrb[11].mxu1  ;;  %v3022_v56 = vld [vmem:[%s3677_s8 + $0x40] sm:$0xff]  }
 0x2c3   :  { %v3024_v58 = vld [vmem:[%s3677_s8 + $0x50] sm:$0xff]  }
 0x2c7   :  { %v632_v59 = vpop.f32.mrb[12].mxu1 }
 0x2c8   :  { %v2692_v60 = vpop.f32.mrb[13].mxu1 }
 0x2c9   :  { %v635_v61 = vpop.f32.mrb[14].mxu1 }
 0x2ca   :  { %v639_v63 = vpack.c.bf16 %v635_v61, %v632_v59  ;;  %v2693_v0 = vpop.f32.mrb[15].mxu1  ;;  %v3025_v59 = vld [vmem:[%s3677_s8 + $0x58] sm:$0xff]  }
 0x2cc   :  { %2711 = vmatmul.mubr.bf16.vlgmr.msra.gmra.mrb[8].mxu0 %v639_v63 }
 0x2cd   :  { %2715 = vmatpush3.bf16.msra.mxu0 %v2998_v62  ;;  %2730 = vmatprep.mubr.msk.bf16.mxu0 %vm3077_vm1, %v3076_v36 }
 0x2ce   :  { %2716 = vmatprep.subr.bf16.mxu0 %v3076_v36 }
 0x2cf   :  { %v880_v2 = vpop.f32.mrb[16].mxu1 }
 0x2d0   :  { %v2740_v3 = vpop.f32.mrb[17].mxu1 }
 0x2d1   :  { %2717 = vmatpush3.bf16.msra.mxu0 %v2999_v1  ;;  %v883_v5 = vpop.f32.mrb[18].mxu1  ;;  %v3026_v1 = vld [vmem:[%s3681_s12 + $0x20] sm:$0xff]  }
 0x2d2   :  { %2718 = vmatprep.subr.bf16.mxu0 %v3076_v36  ;;  %v887_v6 = vpack.c.bf16 %v883_v5, %v880_v2  ;;  %v2741_v7 = vpop.f32.mrb[19].mxu1  ;;  %v3027_v2 = vld [vmem:[%s3681_s12 + $0x28] sm:$0xff]   ;;  %v2420_v3 = vld [vmem:[%s3678_s9] ss:$0 sm:$0xff] }
 0x2d3   :  { %v2421_v5 = vld [vmem:[%s3679_s10] ss:$0 sm:$0xff] }
 0x2d5   :  { %2719 = vmatpush3.bf16.msra.mxu0 %v3000_v4 }
 0x2d6   :  { %2720 = vmatprep.subr.bf16.mxu0 %v3076_v36 }
 0x2d9   :  { %2721 = vmatpush3.bf16.msra.mxu0 %v3001_v8 }
 0x2da   :  { %2722 = vmatprep.subr.bf16.mxu0 %v3076_v36 }
 0x2dd   :  { %2723 = vmatpush3.bf16.msra.mxu0 %v3002_v9 }
 0x2de   :  { %2724 = vmatprep.subr.bf16.mxu0 %v3076_v36 }
 0x2e1   :  { %2725 = vmatpush3.bf16.msra.mxu0 %v3003_v10 }
 0x2e2   :  { %2726 = vmatprep.subr.bf16.mxu0 %v3076_v36 }
 0x2e5   :  { %2727 = vmatpush3.bf16.msra.mxu0 %v3004_v11 }
 0x2e6   :  { %2728 = vmatprep.subr.bf16.mxu0 %v3076_v36 }
 0x2e9   :  { %2729 = vmatpush3.bf16.msra.mxu0 %v3005_v12 }
 0x2ea   :  { %2742 = vmatprep.subr.bf16.mxu0 %v3076_v36 }
 0x2ec   :  { %2731 = vmatmul.mubr.bf16.vlgmr.msra.gmra.mrb[8].mxu0 %v570_v57  ;;  %v3023_v57 = vld [vmem:[%s3677_s8 + $0x48] sm:$0xff]  }
 0x2ed   :  { %2743 = vmatpush3.bf16.msra.mxu0 %v3006_v13  ;;  %2758 = vmatprep.mubr.msk.bf16.mxu0 %vm3077_vm1, %v3076_v36 }
 0x2ee   :  { %2744 = vmatprep.subr.bf16.mxu0 %v3076_v36 }
 0x2f1   :  { %2745 = vmatpush3.bf16.msra.mxu0 %v3007_v14  ;;  %v1402_v14 = vld [vmem:[%s3680_s11] sm:$0x3] }
 0x2f2   :  { %2746 = vmatprep.subr.bf16.mxu0 %v3076_v36 }
 0x2f5   :  { %2747 = vmatpush3.bf16.msra.mxu0 %v3008_v15  ;;  %v2423_v15 = vld [vmem:[%s3680_s11 + $0x2] sm:$0x3] }
 0x2f6   :  { %2748 = vmatprep.subr.bf16.mxu0 %v3076_v36 }
 0x2f9   :  { %2749 = vmatpush3.bf16.msra.mxu0 %v3009_v16  ;;  %v2443_v16 = vld [vmem:[%s3680_s11 + $0x4] sm:$0x3] }
 0x2fa   :  { %2750 = vmatprep.subr.bf16.mxu0 %v3076_v36 }
 0x2fd   :  { %2751 = vmatpush3.bf16.msra.mxu0 %v3010_v17  ;;  %v3028_v17 = vld [vmem:[%s3681_s12 + $0x30] sm:$0xff]  }
 0x2fe   :  { %2752 = vmatprep.subr.bf16.mxu0 %v3076_v36 }
 0x301   :  { %2753 = vmatpush3.bf16.msra.mxu0 %v3011_v18  ;;  %v3029_v18 = vld [vmem:[%s3681_s12 + $0x38] sm:$0xff]  }
 0x302   :  { %2754 = vmatprep.subr.bf16.mxu0 %v3076_v36 }
 0x305   :  { %2755 = vmatpush3.bf16.msra.mxu0 %v3012_v19 }
 0x306   :  { %2756 = vmatprep.subr.bf16.mxu0 %v3076_v36 }
 0x309   :  { %2757 = vmatpush3.bf16.msra.mxu0 %v3013_v20 }
 0x30a   :  { %2828 = vmatprep.subr.bf16.mxu0 %v3076_v36 }
 0x30c   :  { %2759 = vmatmul.mubr.bf16.vlgmr.msra.gmra.mrb[8].mxu0 %v887_v6 }
 0x30d   :  { %2836 = vmatprep.mubr.msk.bf16.mxu0 %vm3077_vm1, %v3076_v36  ;;  %2829 = vmatpush3.bf16.msra.mxu0 %v3026_v1 }
 0x30e   :  { %2830 = vmatprep.subr.bf16.mxu0 %v3076_v36 }
 0x311   :  { %2831 = vmatpush3.bf16.msra.mxu0 %v3027_v2 }
 0x312   :  { %2832 = vmatprep.subr.bf16.mxu0 %v3076_v36 }
 0x315   :  { %2833 = vmatpush3.bf16.msra.mxu0 %v3028_v17  ;;  %v3048_v17 = vld [vmem:[%s3685_s16 + $0x50] sm:$0xff]  }
 0x316   :  { %2834 = vmatprep.subr.bf16.mxu0 %v3076_v36 }
 0x319   :  { %2835 = vmatpush3.bf16.msra.mxu0 %v3029_v18  ;;  %v3049_v18 = vld [vmem:[%s3685_s16 + $0x58] sm:$0xff]  }
 0x31a   :  { %2840 = vmatprep.subr.bf16.mxu0 %v3076_v36 }
 0x3df   :  { %v987_v22 = vpop.f32.mrb[8].mxu0 }
 0x3e0   :  { %v1004_v24 = vmul.f32 %v2382_v21, %v987_v22  ;;  %v2760_v25 = vpop.f32.mrb[9].mxu0 }
 0x3e1   :  { %v990_v26 = vpop.f32.mrb[10].mxu0 }
 0x3e2   :  { %v1012_v27 = vadd.f32 %v2383_v23, %v1004_v24  ;;  %v1005_v28 = vmul.f32 %v2382_v21, %v990_v26  ;;  %v2761_v29 = vpop.f32.mrb[11].mxu0  ;;  %v3030_v24 = vld [vmem:[%s3681_s12] sm:$0xff]  }
 0x3e3   :  { %v3031_v29 = vld [vmem:[%s3681_s12 + $0x8] sm:$0xff]  }
 0x3e4   :  { %v1013_v30 = vadd.f32 %v2383_v23, %v1005_v28  ;;  %v1014_v31 = vmax.f32 %v1012_v27, 0.0 }
 0x3e6   :  { %v1015_v32 = vmax.f32 %v1013_v30, 0.0  ;;  %v3032_v30 = vld [vmem:[%s3681_s12 + $0x10] sm:$0xff]  }
 0x3e8   :  { %v1016_v33 = vpack.c.bf16 %v1015_v32, %v1014_v31 }
 0x3ea   :  { %2763 = vmatpush3.bf16.msra.mxu1 %v1016_v33 }
 0x3eb   :  { %2768 = vmatprep.subr.bf16.mxu1 %v3076_v36 }
 0x3ed   :  { %2765 = vmatmul.mubr.msk.bf16.vlgmr.msra.gmra.mrb[20].mxu1 %vm1018_vm2, %v1017_v34 }
 0x3ee   :  { %2769 = vmatpush3.bf16.msra.mxu1 %v1016_v33  ;;  %2770 = vmatprep.mubr.msk.bf16.mxu1 %vm3077_vm1, %v3076_v36 }
 0x3ef   :  { %2774 = vmatprep.subr.bf16.mxu1 %v3076_v36 }
 0x3f5   :  { %2771 = vmatmul.mubr.msk.bf16.vlgmr.msra.gmra.mrb[24].mxu1 %vm1018_vm2, %v2385_v35  ;;  %v3033_v35 = vld [vmem:[%s3681_s12 + $0x18] sm:$0xff]  }
 0x3f6   :  { %2775 = vmatpush3.bf16.msra.mxu1 %v3014_v37  ;;  %2782 = vmatprep.mubr.msk.bf16.mxu1 %vm3077_vm1, %v3076_v36  ;;  %v3034_v37 = vld [vmem:[%s3681_s12 + $0x40] sm:$0xff]  }
 0x3f7   :  { %2776 = vmatprep.subr.bf16.mxu1 %v3076_v36 }
 0x3fa   :  { %2777 = vmatpush3.bf16.msra.mxu1 %v3015_v38 }
 0x3fb   :  { %2778 = vmatprep.subr.bf16.mxu1 %v3076_v36 }
 0x3fe   :  { %2779 = vmatpush3.bf16.msra.mxu1 %v3016_v39  ;;  %v3035_v39 = vld [vmem:[%s3681_s12 + $0x48] sm:$0xff]  }
 0x3ff   :  { %2780 = vmatprep.subr.bf16.mxu1 %v3076_v36 }
 0x402   :  { %2781 = vmatpush3.bf16.msra.mxu1 %v3017_v40  ;;  %v3036_v40 = vld [vmem:[%s3681_s12 + $0x50] sm:$0xff]  }
 0x403   :  { %2786 = vmatprep.subr.bf16.mxu1 %v3076_v36 }
 0x4c0   :  { %v1056_v41 = vpop.f32.mrb[20].mxu1 }
 0x4c1   :  { %v2766_v42 = vpop.f32.mrb[21].mxu1  ;;  %v1062_v54 = vpack.c.bf16 %v1056_v41, %v1056_v41  ;;  %v3037_v41 = vld [vmem:[%s3681_s12 + $0x58] sm:$0xff]  }
 0x4c2   :  { %v1059_v43 = vpop.f32.mrb[22].mxu1 }
 0x4c3   :  { %v2767_v44 = vpop.f32.mrb[23].mxu1  ;;  %v2458_v43 = vld [vmem:[%s3682_s13] ss:$0 sm:$0xff] }
 0x4c8   :  { %v1110_v45 = vpop.f32.mrb[24].mxu1 }
 0x4c9   :  { %v1116_v47 = vpack.c.bf16 %v1110_v45, %v1110_v45  ;;  %v2772_v48 = vpop.f32.mrb[25].mxu1  ;;  %v2459_v45 = vld [vmem:[%s3683_s14] ss:$0 sm:$0xff] }
 0x4ca   :  { %v1113_v49 = vpop.f32.mrb[26].mxu1 }
 0x4cb   :  { %v2773_v50 = vpop.f32.mrb[27].mxu1  ;;  %2783 = vmatmul.mubr.msk.bf16.vlgmr.msra.gmra.mrb[28].mxu1 %vm1150_vm3, %v1116_v47 }
 0x4cc   :  { %2787 = vmatpush3.bf16.msra.mxu1 %v3018_v46  ;;  %2794 = vmatprep.mubr.msk.bf16.mxu1 %vm3077_vm1, %v3076_v36 }
 0x4cd   :  { %2788 = vmatprep.subr.bf16.mxu1 %v3076_v36 }
 0x4d0   :  { %2789 = vmatpush3.bf16.msra.mxu1 %v3019_v51 }
 0x4d1   :  { %2790 = vmatprep.subr.bf16.mxu1 %v3076_v36 }
 0x4d4   :  { %2791 = vmatpush3.bf16.msra.mxu1 %v3020_v52 }
 0x4d5   :  { %2792 = vmatprep.subr.bf16.mxu1 %v3076_v36 }
 0x4d8   :  { %2793 = vmatpush3.bf16.msra.mxu1 %v3021_v53 }
 0x4d9   :  { %2798 = vmatprep.subr.bf16.mxu1 %v3076_v36 }
 0x4db   :  { %2795 = vmatmul.mubr.msk.bf16.vlgmr.msra.gmra.mrb[28].mxu1 %vm1150_vm3, %v1062_v54  ;;  %v1790_v54 = vld [vmem:[%s3684_s15] sm:$0x1] }
 0x4dc   :  { %2799 = vmatpush3.bf16.msra.mxu1 %v1016_v33  ;;  %2800 = vmatprep.mubr.msk.bf16.mxu1 %vm3077_vm1, %v3076_v36 }
 0x4dd   :  { %2804 = vmatprep.subr.bf16.mxu1 %v3076_v36 }
 0x4e3   :  { %2801 = vmatmul.mubr.msk.bf16.vlgmr.msra.gmra.mrb[32].mxu1 %vm1018_vm2, %v2405_v55  ;;  %v2481_v55 = vld [vmem:[%s3684_s15 + $0x2] sm:$0x1] }
 0x4e4   :  { %2805 = vmatpush3.bf16.msra.mxu1 %v3022_v56  ;;  %2812 = vmatprep.mubr.msk.bf16.mxu1 %vm3077_vm1, %v3076_v36  ;;  %v2461_v56 = vld [vmem:[%s3684_s15 + $0x1] sm:$0x1] }
 0x4e5   :  { %2806 = vmatprep.subr.bf16.mxu1 %v3076_v36 }
 0x4e8   :  { %2807 = vmatpush3.bf16.msra.mxu1 %v3023_v57  ;;  %v3038_v57 = vld [vmem:[%s3685_s16 + $0x20] sm:$0xff]  }
 0x4e9   :  { %2808 = vmatprep.subr.bf16.mxu1 %v3076_v36 }
 0x4ec   :  { %2809 = vmatpush3.bf16.msra.mxu1 %v3024_v58  ;;  %v3039_v58 = vld [vmem:[%s3685_s16 + $0x28] sm:$0xff]  }
 0x4ed   :  { %2810 = vmatprep.subr.bf16.mxu1 %v3076_v36 }
 0x4f0   :  { %2811 = vmatpush3.bf16.msra.mxu1 %v3025_v59  ;;  %v3040_v59 = vld [vmem:[%s3685_s16 + $0x30] sm:$0xff]  }
 0x4f1   :  { %2816 = vmatprep.subr.bf16.mxu1 %v3076_v36 }
 0x5b6   :  { %v1300_v60 = vpop.f32.mrb[32].mxu1 }
 0x5b7   :  { %v1306_v61 = vpack.c.bf16 %v1300_v60, %v1300_v60  ;;  %v2802_v62 = vpop.f32.mrb[33].mxu1  ;;  %v3041_v60 = vld [vmem:[%s3685_s16 + $0x38] sm:$0xff]  }
 0x5b8   :  { %v1303_v63 = vpop.f32.mrb[34].mxu1 }
 0x5b9   :  { %v2803_v0 = vpop.f32.mrb[35].mxu1  ;;  %2813 = vmatmul.mubr.msk.bf16.vlgmr.msra.gmra.mrb[28].mxu1 %vm1150_vm3, %v1306_v61 }
 0x5ba   :  { %2818 = vmatprep.mubr.msk.bf16.mxu1 %vm3077_vm1, %v3076_v36 }
 0x68c   :  { %v1377_v4 = vpop.f32.mrb[28].mxu1 }
 0x68d   :  { %v1392_v6 = vmul.f32 %v2420_v3, %v1377_v4  ;;  %v2814_v7 = vpop.f32.mrb[29].mxu1 }
 0x68e   :  { %v1380_v8 = vpop.f32.mrb[30].mxu1 }
 0x68f   :  { %v1399_v9 = vadd.f32 %v2421_v5, %v1392_v6  ;;  %v2815_v10 = vpop.f32.mrb[31].mxu1  ;;  %v3042_v6 = vld [vmem:[%s3685_s16] sm:$0xff]  }
 0x691   :  { %v1400_v11 = vmax.f32 %v1399_v9, 0.0 }
 0x693   :  { %v1401_v12 = vpack.c.bf16 %v1400_v11, %v1400_v11  ;;  %v3043_v11 = vld [vmem:[%s3685_s16 + $0x8] sm:$0xff]  }
 0x695   :  { %v1409_v13 = vsel %vm1407_vm4, %v1401_v12, 0  ;;  %v3044_v12 = vld [vmem:[%s3685_s16 + $0x10] sm:$0xff]  }
 0x696   :  { %2817 = vmatpush3.bf16.msra.mxu1 %v1409_v13 }
 0x697   :  { %2822 = vmatprep.subr.bf16.mxu1 %v3076_v36 }
 0x699   :  { %2819 = vmatmul.mubr.msk.bf16.vlgmr.msra.gmra.mrb[36].mxu1 %vm1403_vm5, %v1402_v14  ;;  %v3046_v14 = vld [vmem:[%s3685_s16 + $0x40] sm:$0xff]  }
 0x69a   :  { %2823 = vmatpush3.bf16.msra.mxu1 %v1409_v13  ;;  %2824 = vmatprep.mubr.msk.bf16.mxu1 %vm3077_vm1, %v3076_v36 }
 0x69b   :  { %2852 = vmatprep.subr.bf16.mxu1 %v3076_v36 }
 0x6a1   :  { %2825 = vmatmul.mubr.msk.bf16.vlgmr.msra.gmra.mrb[40].mxu1 %vm1403_vm5, %v2423_v15 }
 0x6a2   :  { %2853 = vmatpush3.bf16.msra.mxu1 %v1409_v13  ;;  %2854 = vmatprep.mubr.msk.bf16.mxu1 %vm3077_vm1, %v3076_v36  ;;  %v3045_v13 = vld [vmem:[%s3685_s16 + $0x18] sm:$0xff]  }
 0x6a3   :  { %2870 = vmatprep.subr.bf16.mxu1 %v3076_v36 }
 0x6a9   :  { %2855 = vmatmul.mubr.msk.bf16.vlgmr.msra.gmra.mrb[44].mxu1 %vm1403_vm5, %v2443_v16  ;;  %v3047_v16 = vld [vmem:[%s3685_s16 + $0x48] sm:$0xff]  }
 0x6aa   :  { %2872 = vmatprep.mubr.msk.bf16.mxu1 %vm3077_vm1, %v3076_v36 }
 0x76c   :  { %v1445_v19 = vpop.f32.mrb[36].mxu1 }
 0x76d   :  { %v2820_v20 = vpop.f32.mrb[37].mxu1  ;;  %v1451_v38 = vpack.c.bf16 %v1445_v19, %v1445_v19 }
 0x76e   :  { %v1448_v21 = vpop.f32.mrb[38].mxu1  ;;  %v3050_v20 = vld [vmem:[%s3688_s19] sm:$0xff]  }
 0x76f   :  { %v2821_v22 = vpop.f32.mrb[39].mxu1  ;;  %v3051_v21 = vld [vmem:[%s3688_s19 + $0x8] sm:$0xff]  }
 0x770   :  { %v2496_v22 = vld [vmem:[%s3686_s17] ss:$0 sm:$0xff] }
 0x774   :  { %v1499_v23 = vpop.f32.mrb[40].mxu1 }
 0x775   :  { %v1505_v25 = vpack.c.bf16 %v1499_v23, %v1499_v23  ;;  %v2826_v26 = vpop.f32.mrb[41].mxu1 }
 0x776   :  { %v1502_v27 = vpop.f32.mrb[42].mxu1 }
 0x777   :  { %v2827_v28 = vpop.f32.mrb[43].mxu1  ;;  %2837 = vmatmul.mubr.msk.bf16.vlgmr.msra.gmra.mrb[12].mxu0 %vm1150_vm3, %v1505_v25 }
 0x778   :  { %2841 = vmatpush3.bf16.msra.mxu0 %v3030_v24  ;;  %2848 = vmatprep.mubr.msk.bf16.mxu0 %vm3077_vm1, %v3076_v36  ;;  %v2497_v24 = vld [vmem:[%s3687_s18] ss:$0 sm:$0xff] }
 0x779   :  { %2842 = vmatprep.subr.bf16.mxu0 %v3076_v36 }
 0x77c   :  { %2843 = vmatpush3.bf16.msra.mxu0 %v3031_v29  ;;  %v1688_v31 = vpop.f32.mrb[44].mxu1 }
 0x77d   :  { %2844 = vmatprep.subr.bf16.mxu0 %v3076_v36  ;;  %v2856_v32 = vpop.f32.mrb[45].mxu1  ;;  %v1694_v42 = vpack.c.bf16 %v1688_v31, %v1688_v31  ;;  %v2498_v31 = vld [vmem:[%s3689_s20] ss:$0 sm:$0xff]  ;;  %s3052_s20 = scalar_lea.vmem %s2269_s27, 32 }
 0x77e   :  { %v1691_v33 = vpop.f32.mrb[46].mxu1  ;;  %v2502_v32 = vld [vmem:[%s3690_s21] ss:$0 sm:$0xff]  ;;  %p3053_p0 = scmp.ne.s32.totalorder %s2269_s27, %s3052_s20  ;;  %p3058_p2 = scmp.lt.s32.totalorder %s3052_s20, %s3052_s20 }
 0x77f   :  { %v2857_v34 = vpop.f32.mrb[47].mxu1 }
 0x780   :  { %2845 = vmatpush3.bf16.msra.mxu0 %v3032_v30  ;;  %p3059_p3 = por %p3058_p2, %p3057_p1 }
 0x781   :  { %2846 = vmatprep.subr.bf16.mxu0 %v3076_v36 }
 0x782   :  { %p3060_p4 = pnand %p3059_p3, %p3053_p0 }
 0x784   :  { %2847 = vmatpush3.bf16.msra.mxu0 %v3033_v35 }
 0x785   :  { %2858 = vmatprep.subr.bf16.mxu0 %v3076_v36 }
 0x787   :  { %2849 = vmatmul.mubr.msk.bf16.vlgmr.msra.gmra.mrb[12].mxu0 %vm1150_vm3, %v1451_v38  ;;  %v2503_v38 = vld [vmem:[%s3691_s22] ss:$0 sm:$0xff] }
 0x788   :  { %2859 = vmatpush3.bf16.msra.mxu0 %v3034_v37  ;;  %2866 = vmatprep.mubr.msk.bf16.mxu0 %vm3077_vm1, %v3076_v36 }
 0x789   :  { %2860 = vmatprep.subr.bf16.mxu0 %v3076_v36 }
 0x78c   :  { %2861 = vmatpush3.bf16.msra.mxu0 %v3035_v39 }
 0x78d   :  { %2862 = vmatprep.subr.bf16.mxu0 %v3076_v36 }
 0x790   :  { %2863 = vmatpush3.bf16.msra.mxu0 %v3036_v40 }
 0x791   :  { %2864 = vmatprep.subr.bf16.mxu0 %v3076_v36 }
 0x794   :  { %2865 = vmatpush3.bf16.msra.mxu0 %v3037_v41 }
 0x795   :  { %2906 = vmatprep.subr.bf16.mxu0 %v3076_v36 }
 0x797   :  { %2867 = vmatmul.mubr.msk.bf16.vlgmr.msra.gmra.mrb[12].mxu0 %vm1150_vm3, %v1694_v42 }
 0x798   :  { %2908 = vmatprep.mubr.msk.bf16.mxu0 %vm3077_vm1, %v3076_v36 }
 0x86a   :  { %v1765_v44 = vpop.f32.mrb[12].mxu0 }
 0x86b   :  { %v1780_v46 = vmul.f32 %v2458_v43, %v1765_v44  ;;  %v2868_v47 = vpop.f32.mrb[13].mxu0 }
 0x86c   :  { %v1768_v48 = vpop.f32.mrb[14].mxu0 }
 0x86d   :  { %v1787_v49 = vadd.f32 %v2459_v45, %v1780_v46  ;;  %v2869_v50 = vpop.f32.mrb[15].mxu0 }
 0x86f   :  { %v1788_v51 = vmax.f32 %v1787_v49, 0.0 }
 0x871   :  { %v1789_v52 = vpack.c.bf16 %v1788_v51, %v1788_v51 }
 0x873   :  { %v1797_v53 = vsel %vm1795_vm6, %v1789_v52, 0 }
 0x874   :  { %2871 = vmatpush3.bf16.msra.mxu1 %v1797_v53  ;;  %2907 = vmatpush3.bf16.msra.mxu0 %v1797_v53 }
 0x875   :  { %2876 = vmatprep.subr.bf16.mxu1 %v3076_v36  ;;  %2924 = vmatprep.subr.bf16.mxu0 %v3076_v36 }
 0x877   :  { %2873 = vmatmul.mubr.msk.bf16.vlgmr.msra.gmra.mrb[48].mxu1 %vm1791_vm7, %v1790_v54  ;;  %2909 = vmatmul.mubr.msk.bf16.vlgmr.msra.gmra.mrb[16].mxu0 %vm1791_vm7, %v2481_v55 }
 0x878   :  { %2877 = vmatpush3.bf16.msra.mxu1 %v1797_v53  ;;  %2878 = vmatprep.mubr.msk.bf16.mxu1 %vm3077_vm1, %v3076_v36 }
 0x879   :  { %2882 = vmatprep.subr.bf16.mxu1 %v3076_v36  ;;  %2928 = vmatprep.mubr.msk.bf16.mxu0 %vm3077_vm1, %v3076_v36 }
 0x87a   :  { %2925 = vmatpush3.bf16.msra.mxu0 %v3050_v20 }
 0x87b   :  { %2926 = vmatprep.subr.bf16.mxu0 %v3076_v36 }
 0x87e   :  { %2927 = vmatpush3.bf16.msra.mxu0 %v3051_v21 }
 0x87f   :  { %2879 = vmatmul.mubr.msk.bf16.vlgmr.msra.gmra.mrb[52].mxu1 %vm1791_vm7, %v2461_v56 }
 0x880   :  { %2883 = vmatpush3.bf16.msra.mxu1 %v3038_v57  ;;  %2890 = vmatprep.mubr.msk.bf16.mxu1 %vm3077_vm1, %v3076_v36 }
 0x881   :  { %2884 = vmatprep.subr.bf16.mxu1 %v3076_v36 }
 0x884   :  { %2885 = vmatpush3.bf16.msra.mxu1 %v3039_v58 }
 0x885   :  { %2886 = vmatprep.subr.bf16.mxu1 %v3076_v36 }
 0x888   :  { %2887 = vmatpush3.bf16.msra.mxu1 %v3040_v59 }
 0x889   :  { %2888 = vmatprep.subr.bf16.mxu1 %v3076_v36 }
 0x88c   :  { %2889 = vmatpush3.bf16.msra.mxu1 %v3041_v60 }
 0x88d   :  { %2894 = vmatprep.subr.bf16.mxu1 %v3076_v36 }
 0x94a   :  { %v1833_v61 = vpop.f32.mrb[48].mxu1  ;;  %v2076_v62 = vpop.f32.mrb[16].mxu0 }
 0x94b   :  { %v2874_v63 = vpop.f32.mrb[49].mxu1  ;;  %v2910_v0 = vpop.f32.mrb[17].mxu0  ;;  %v1839_v15 = vpack.c.bf16 %v1833_v61, %v1833_v61  ;;  %v2082_v19 = vpack.c.bf16 %v2076_v62, %v2076_v62 }
 0x94c   :  { %v1836_v1 = vpop.f32.mrb[50].mxu1  ;;  %v2079_v2 = vpop.f32.mrb[18].mxu0 }
 0x94d   :  { %v2875_v3 = vpop.f32.mrb[51].mxu1  ;;  %v2911_v4 = vpop.f32.mrb[19].mxu0 }
 0x952   :  { %v1887_v5 = vpop.f32.mrb[52].mxu1 }
 0x953   :  { %v1893_v7 = vpack.c.bf16 %v1887_v5, %v1887_v5  ;;  %v2880_v8 = vpop.f32.mrb[53].mxu1 }
 0x954   :  { %v1890_v9 = vpop.f32.mrb[54].mxu1 }
 0x955   :  { %2891 = vmatmul.mubr.msk.bf16.vlgmr.msra.gmra.mrb[56].mxu1 %vm1150_vm3, %v1893_v7  ;;  %v2881_v10 = vpop.f32.mrb[55].mxu1 }
 0x956   :  { %2895 = vmatpush3.bf16.msra.mxu1 %v3042_v6  ;;  %2902 = vmatprep.mubr.msk.bf16.mxu1 %vm3077_vm1, %v3076_v36 }
 0x957   :  { %2896 = vmatprep.subr.bf16.mxu1 %v3076_v36 }
 0x95a   :  { %2897 = vmatpush3.bf16.msra.mxu1 %v3043_v11 }
 0x95b   :  { %2898 = vmatprep.subr.bf16.mxu1 %v3076_v36 }
 0x95e   :  { %2899 = vmatpush3.bf16.msra.mxu1 %v3044_v12 }
 0x95f   :  { %2900 = vmatprep.subr.bf16.mxu1 %v3076_v36 }
 0x962   :  { %2901 = vmatpush3.bf16.msra.mxu1 %v3045_v13 }
 0x963   :  { %2912 = vmatprep.subr.bf16.mxu1 %v3076_v36 }
 0x965   :  { %2903 = vmatmul.mubr.msk.bf16.vlgmr.msra.gmra.mrb[56].mxu1 %vm1150_vm3, %v1839_v15 }
 0x966   :  { %2913 = vmatpush3.bf16.msra.mxu1 %v3046_v14  ;;  %2920 = vmatprep.mubr.msk.bf16.mxu1 %vm3077_vm1, %v3076_v36 }
 0x967   :  { %2914 = vmatprep.subr.bf16.mxu1 %v3076_v36 }
 0x96a   :  { %2915 = vmatpush3.bf16.msra.mxu1 %v3047_v16 }
 0x96b   :  { %2916 = vmatprep.subr.bf16.mxu1 %v3076_v36 }
 0x96e   :  { %2917 = vmatpush3.bf16.msra.mxu1 %v3048_v17 }
 0x96f   :  { %2918 = vmatprep.subr.bf16.mxu1 %v3076_v36 }
 0x972   :  { %2919 = vmatpush3.bf16.msra.mxu1 %v3049_v18 }
 0x975   :  { %2921 = vmatmul.mubr.msk.bf16.vlgmr.msra.gmra.mrb[56].mxu1 %vm1150_vm3, %v2082_v19 }
 0xa48   :  { %v2153_v23 = vpop.f32.mrb[56].mxu1 }
 0xa49   :  { %v2168_v25 = vmul.f32 %v2496_v22, %v2153_v23  ;;  %v2922_v26 = vpop.f32.mrb[57].mxu1 }
 0xa4a   :  { %v2156_v27 = vpop.f32.mrb[58].mxu1 }
 0xa4b   :  { %v2175_v28 = vadd.f32 %v2497_v24, %v2168_v25  ;;  %v2923_v29 = vpop.f32.mrb[59].mxu1 }
 0xa4d   :  { %v2176_v36 = vmax.f32 %v2175_v28, 0.0 }
 0xa4f   :  { %v2184_v30 = vpack.c.bf16 %v2176_v36, %v2176_v36 }
 0xa51   :  { %2929 = vmatmul.mubr.msk.bf16.vlgmr.msra.gmra.mrb[20].mxu0 %vm96_vm0, %v2184_v30 }
 0xb24   :  { %v2240_v33 = vpop.f32.mrb[20].mxu0 }
 0xb25   :  { %v2241_v34 = vadd.f32 %v2498_v31, %v2240_v33  ;;  %v2930_v35 = vpop.f32.mrb[21].mxu0 }
 0xb26   :  { %v2243_v37 = vpop.f32.mrb[22].mxu0 }
 0xb27   :  { %v2252_v39 = vmax.f32 %v2241_v34, %v2502_v32  ;;  %v2931_v40 = vpop.f32.mrb[23].mxu0 }
 0xb29   :  { %v2259_v41 = vmin.f32 %v2252_v39, %v2503_v38 }
 0xb2b   :  { %2261 = vst.msk [vmem:[#allocation2] sm:$0x3] %vm2260_vm8, %v2259_v41 }
 0xb2c   :  { %3063 = shalt.err (!%p3060_p4)
}
 0xb2d   :  { %s3064_s3 = scalar_lea.hbm %s3692_s23, 32 }
 0xb2e   :  { %p3065_p5 = scmp.ne.s32.totalorder %s3692_s23, %s3064_s3  ;;  %p3068_p6 = scmp.lt.u32.totalorder %s3064_s3, %s3692_s23 }
 0xb30   :  { %p3070_p7 = pnand %p3068_p6, %p3065_p5 }
 0xb32   :  { %3073 = shalt.err (!%p3070_p7)
}
 0xb33   :  { %2271 = dma.vmem_to_hbm [thread:$0]  %s2269_s27, 32, %s3692_s23, [#allocation3]  }
 0xb34   :  { %3074 = dma.done.wait [#allocation3], 32  }
 0xb35   :  { %3075 = vsyncadd [#allocation3], 4294967264 }
 0xb36   :  { %2275 = vsyncpa [#allocation3], 1 }

</bundles_post_ra>
